<compile_context>
chip_gen: v7x
topology: tpu7x:2x2x1
jax: 0.10.0
libtpu: 0.0.40
codegen_flags: <defaults>
</compile_context>

<pallas_src>
import functools

import jax
import jax.numpy as jnp
from jax.experimental import pallas as pl
from jax.experimental.pallas import tpu as pltpu


def _default_blockdiag_l2():
    """blockdiag(W2,W2) layer 2 pays off on 256-wide MXUs (v6e/v7x);
    on 128-wide MXUs (<= v5) two split matmuls sharing W2 are cheaper."""
    try:
        kind = jax.devices()[0].device_kind.lower()
    except Exception:
        return True
    if any(tag in kind for tag in ("v2", "v3", "v4", "v5")):
        return False
    return True


def _mlp_kernel_fused(x_ref, w1_ref, b1_ref, w2_ref, b2_ref, w3_ref, b3_ref,
                      o_ref):
    """Both argument orders folded into the lane (N) axis; blockdiag layer 2."""
    x = x_ref[...]                                          # (tb, 2F) bf16

    # layer 1: one matmul against [W1 | W1_rowswapped] -> [h_a | h_b]
    h = jnp.dot(x, w1_ref[...], preferred_element_type=jnp.float32) + b1_ref[...]
    h = jnp.maximum(h, 0.0)                                 # (tb, 600)

    # Dropout(p=0) is identity.

    # layer 2: one matmul against blockdiag(W2, W2) -> [g_a | g_b]
    h = jnp.dot(h.astype(jnp.bfloat16), w2_ref[...],
                preferred_element_type=jnp.float32) + b2_ref[...]
    h = jnp.maximum(h, 0.0)                                 # (tb, 200)

    # layer 3 on VPU+XLU: one 200-lane reduce gives (v_a - b3) + (v_b - b3)
    vsum = jnp.sum(h * w3_ref[...], axis=-1, keepdims=True)  # (tb, 1)
    v = 0.5 * vsum + b3_ref[...]                             # (v_a + v_b) / 2
    o_ref[...] = jnp.logaddexp(v, 0.0).astype(o_ref.dtype)   # stable softplus


def _mlp_kernel_split(x_ref, w1a_ref, w1b_ref, b1_ref, w2_ref, b2_ref,
                      w3_ref, b3_ref, o_ref):
    """Variant for 128-wide MXUs (v5e and older): two matmul chains share W2
    instead of a zero-padded blockdiag; still a single x12 input stream."""
    x = x_ref[...]                                          # (tb, 2F) bf16

    ha = jnp.maximum(
        jnp.dot(x, w1a_ref[...], preferred_element_type=jnp.float32)
        + b1_ref[...], 0.0)                                 # order [x1|x2]
    hb = jnp.maximum(
        jnp.dot(x, w1b_ref[...], preferred_element_type=jnp.float32)
        + b1_ref[...], 0.0)                                 # order [x2|x1]

    ga = jnp.maximum(
        jnp.dot(ha.astype(jnp.bfloat16), w2_ref[...],
                preferred_element_type=jnp.float32) + b2_ref[...], 0.0)
    gb = jnp.maximum(
        jnp.dot(hb.astype(jnp.bfloat16), w2_ref[...],
                preferred_element_type=jnp.float32) + b2_ref[...], 0.0)

    vsum = jnp.sum((ga + gb) * w3_ref[...], axis=-1, keepdims=True)
    v = 0.5 * vsum + b3_ref[...]
    o_ref[...] = jnp.logaddexp(v, 0.0).astype(o_ref.dtype)


@functools.partial(jax.jit, static_argnames=("batch_tile", "blockdiag_l2"))
def _mlp_forward(x1, x2, params, batch_tile, blockdiag_l2):
    w1, b1, w2, b2, w3, b3 = params
    B, F = x1.shape
    H1 = w1.shape[1]   # 300
    H2 = w2.shape[1]   # 100

    # --- tile-size selection -------------------------------------------------
    tb = int(batch_tile)
    assert tb > 0 and tb % 16 == 0, "batch_tile must be a positive multiple of 16"
    tb = min(tb, max(16, pl.cdiv(B, 16) * 16))          # never over-pad tiny batches
    if B > 16 and pl.cdiv(B, tb) < 2:
        # >=2 grid blocks so both v7x TensorCores get work (harmless elsewhere)
        tb = max(16, ((pl.cdiv(B, 2) + 15) // 16) * 16)
    Bp = pl.cdiv(B, tb) * tb

    # --- input prep: single bf16 [x1|x2] stream ------------------------------
    x12 = jnp.concatenate([x1, x2], axis=-1).astype(jnp.bfloat16)   # (B, 2F)
    if Bp != B:
        x12 = jnp.pad(x12, ((0, Bp - B), (0, 0)))

    # --- weight prep (the [x2|x1] ordering lives in the weights) -------------
    w1_swap = jnp.concatenate([w1[F:], w1[:F]], axis=0)   # (2F, H1): layer 1 of [x2|x1]
    b3s = b3.reshape(1, 1)

    if blockdiag_l2:
        w1p = jnp.concatenate([w1, w1_swap], axis=1).astype(jnp.bfloat16)  # (2F, 2H1)
        b1p = jnp.concatenate([b1, b1]).reshape(1, 2 * H1)
        w2p = (jnp.zeros((2 * H1, 2 * H2), jnp.float32)
               .at[:H1, :H2].set(w2)
               .at[H1:, H2:].set(w2)).astype(jnp.bfloat16)                 # (2H1, 2H2)
        b2p = jnp.concatenate([b2, b2]).reshape(1, 2 * H2)
        w3p = jnp.concatenate([w3[:, 0], w3[:, 0]]).reshape(1, 2 * H2)
        kernel = _mlp_kernel_fused
        weights = (w1p, b1p, w2p, b2p, w3p, b3s)
    else:
        kernel = _mlp_kernel_split
        weights = (w1.astype(jnp.bfloat16), w1_swap.astype(jnp.bfloat16),
                   b1.reshape(1, H1), w2.astype(jnp.bfloat16),
                   b2.reshape(1, H2), w3.reshape(1, H2), b3s)

    def _full(a):  # grid-invariant full-array block (stays resident)
        return pl.BlockSpec(a.shape, lambda i: (0,) * a.ndim)

    out = pl.pallas_call(
        kernel,
        out_shape=jax.ShapeDtypeStruct((Bp, 1), jnp.float32),
        grid_spec=pltpu.PrefetchScalarGridSpec(
            num_scalar_prefetch=0,
            grid=(Bp // tb,),
            in_specs=[pl.BlockSpec((tb, 2 * F), lambda i: (i, 0))]
                     + [_full(a) for a in weights],
            out_specs=pl.BlockSpec((tb, 1), lambda i: (i, 0)),
        ),
        compiler_params=pltpu.CompilerParams(
            dimension_semantics=("parallel",)),
    )(x12, *weights)

    return out[:B]


def mlp_kernel_forward(x1, x2, params, batch_tile=1024, blockdiag_l2=None):
    """x1, x2: (B, F) float32.  Returns (B, 1) float32.

    batch_tile: rows per grid step (multiple of 16).  512-2048 keeps the MXU
    full on v6e/v7x; stay <=1024 on v5e unless the scoped VMEM limit is raised.
    blockdiag_l2: None = auto-detect from the local chip (blockdiag layer 2 on
    v6e/v7x, split layer 2 on v5e-class 128-wide MXUs).
    """
    if blockdiag_l2 is None:
        blockdiag_l2 = _default_blockdiag_l2()
    return _mlp_forward(x1, x2, params, batch_tile=int(batch_tile),
                        blockdiag_l2=bool(blockdiag_l2))


def init_mlp_params(key, feature_dim):
    """Deterministic init mimicking torch.nn.Linear defaults:
    U(-1/sqrt(fan_in), 1/sqrt(fan_in)) for weights and biases."""
    dims = [2 * feature_dim, 300, 100, 1]
    params = []
    for i in range(3):
        fan_in, fan_out = dims[i], dims[i + 1]
        key, kw, kb = jax.random.split(key, 3)
        bound = 1.0 / jnp.sqrt(fan_in)
        # Stored as (in, out) so the kernel does x @ W.
        w = jax.random.uniform(kw, (fan_in, fan_out), jnp.float32, -bound, bound)
        b = jax.random.uniform(kb, (fan_out,), jnp.float32, -bound, bound)
        params += [w, b]
    return tuple(params)


def reference_forward(x1, x2, params):
    """Pure-JAX f32 reference for sanity checking."""
    w1, b1, w2, b2, w3, b3 = params

    def mlp(x):
        h = jnp.maximum(x @ w1 + b1, 0.0)
        h = jnp.maximum(h @ w2 + b2, 0.0)
        return h @ w3 + b3

    v1 = mlp(jnp.concatenate([x1, x2], axis=-1))
    v2 = mlp(jnp.concatenate([x2, x1], axis=-1))
    return jax.nn.softplus((v1 + v2) / 2.0)


if __name__ == "__main__":
    feature_dim = 16
    batch = 200          # not a multiple of the tile -> exercises padding + grid>1

    key = jax.random.PRNGKey(0)
    k_params, k_x1, k_x2 = jax.random.split(key, 3)

    params = init_mlp_params(k_params, feature_dim)
    x1 = jax.random.normal(k_x1, (batch, feature_dim), jnp.float32)
    x2 = jax.random.normal(k_x2, (batch, feature_dim), jnp.float32)

    ref = reference_forward(x1, x2, params)

    # Run the auto-selected layer-2 layout for this chip, plus the alternate
    # path, so both code paths are validated regardless of TPU generation.
    for bd in (None, not _default_blockdiag_l2()):
        out = mlp_kernel_forward(x1, x2, params, blockdiag_l2=bd)
        out = jax.block_until_ready(out)
        assert out.shape == (batch, 1), out.shape
        err = jnp.max(jnp.abs(out - ref))
        # bf16 MXU matmuls -> relaxed tolerance vs. the pure-f32 reference.
        assert jnp.allclose(out, ref, atol=3e-2, rtol=3e-2), f"max abs err {err}"

    print("KERNEL_OK")
</pallas_src>

<mosaic_0001>
module attributes {stable_mosaic.version = 11 : i64} {
  func.func @_mlp_kernel_fused(%arg0: i32, %arg1: memref<112x32xbf16, #tpu.memory_space<vmem>>, %arg2: memref<32x600xbf16, #tpu.memory_space<vmem>>, %arg3: memref<1x600xf32, #tpu.memory_space<vmem>>, %arg4: memref<600x200xbf16, #tpu.memory_space<vmem>>, %arg5: memref<1x200xf32, #tpu.memory_space<vmem>>, %arg6: memref<1x200xf32, #tpu.memory_space<vmem>>, %arg7: memref<1x1xf32, #tpu.memory_space<vmem>>, %arg8: memref<112x1xf32, #tpu.memory_space<vmem>>) attributes {dimension_semantics = [#tpu.dimension_semantics<parallel>], iteration_bounds = array<i64: 2>, scalar_prefetch = 0 : i64, scratch_operands = 0 : i64, tpu.core_type = #tpu.core_type<tc>, window_params = [{transform_indices = @transform_0, window_bounds = array<i64: 112, 32>}, {pipeline_mode = #tpu.pipeline_mode<synchronous>, transform_indices = @transform_1, window_bounds = array<i64: 32, 600>}, {pipeline_mode = #tpu.pipeline_mode<synchronous>, transform_indices = @transform_2, window_bounds = array<i64: 1, 600>}, {pipeline_mode = #tpu.pipeline_mode<synchronous>, transform_indices = @transform_3, window_bounds = array<i64: 600, 200>}, {pipeline_mode = #tpu.pipeline_mode<synchronous>, transform_indices = @transform_4, window_bounds = array<i64: 1, 200>}, {pipeline_mode = #tpu.pipeline_mode<synchronous>, transform_indices = @transform_5, window_bounds = array<i64: 1, 200>}, {pipeline_mode = #tpu.pipeline_mode<synchronous>, transform_indices = @transform_6, window_bounds = array<i64: 1, 1>}, {transform_indices = @transform_7, window_bounds = array<i64: 112, 1>}]} {
    %c0 = arith.constant 0 : index
    %c0_0 = arith.constant 0 : index
    %0 = vector.load %arg1[%c0, %c0_0] : memref<112x32xbf16, #tpu.memory_space<vmem>>, vector<112x32xbf16>
    %c0_1 = arith.constant 0 : index
    %c0_2 = arith.constant 0 : index
    %1 = vector.load %arg2[%c0_1, %c0_2] : memref<32x600xbf16, #tpu.memory_space<vmem>>, vector<32x600xbf16>
    %cst = arith.constant dense<0.000000e+00> : vector<112x600xf32>
    %2 = tpu.matmul %0, %1, %cst {dimension_numbers = #tpu.dot_dimension_numbers<[1], [0], [0], [1], [0, 0, 1, 1], [], []>} : vector<112x32xbf16>, vector<32x600xbf16>, vector<112x600xf32> -> vector<112x600xf32>
    %c0_3 = arith.constant 0 : index
    %c0_4 = arith.constant 0 : index
    %3 = vector.load %arg3[%c0_3, %c0_4] : memref<1x600xf32, #tpu.memory_space<vmem>>, vector<1x600xf32>
    %4 = vector.broadcast %3 : vector<1x600xf32> to vector<112x600xf32>
    %5 = arith.addf %2, %4 : vector<112x600xf32>
    %cst_5 = arith.constant 0.000000e+00 : f32
    %6 = vector.broadcast %cst_5 : f32 to vector<112x600xf32>
    %7 = arith.maximumf %5, %6 : vector<112x600xf32>
    %8 = arith.truncf %7 : vector<112x600xf32> to vector<112x600xbf16>
    %c0_6 = arith.constant 0 : index
    %c0_7 = arith.constant 0 : index
    %9 = vector.load %arg4[%c0_6, %c0_7] : memref<600x200xbf16, #tpu.memory_space<vmem>>, vector<600x200xbf16>
    %cst_8 = arith.constant dense<0.000000e+00> : vector<112x200xf32>
    %10 = tpu.matmul %8, %9, %cst_8 {dimension_numbers = #tpu.dot_dimension_numbers<[1], [0], [0], [1], [0, 0, 1, 1], [], []>} : vector<112x600xbf16>, vector<600x200xbf16>, vector<112x200xf32> -> vector<112x200xf32>
    %c0_9 = arith.constant 0 : index
    %c0_10 = arith.constant 0 : index
    %11 = vector.load %arg5[%c0_9, %c0_10] : memref<1x200xf32, #tpu.memory_space<vmem>>, vector<1x200xf32>
    %12 = vector.broadcast %11 : vector<1x200xf32> to vector<112x200xf32>
    %13 = arith.addf %10, %12 : vector<112x200xf32>
    %cst_11 = arith.constant 0.000000e+00 : f32
    %14 = vector.broadcast %cst_11 : f32 to vector<112x200xf32>
    %15 = arith.maximumf %13, %14 : vector<112x200xf32>
    %c0_12 = arith.constant 0 : index
    %c0_13 = arith.constant 0 : index
    %16 = vector.load %arg6[%c0_12, %c0_13] : memref<1x200xf32, #tpu.memory_space<vmem>>, vector<1x200xf32>
    %17 = vector.broadcast %16 : vector<1x200xf32> to vector<112x200xf32>
    %18 = arith.mulf %15, %17 : vector<112x200xf32>
    %cst_14 = arith.constant dense<0.000000e+00> : vector<112xf32>
    %19 = vector.multi_reduction <add>, %18, %cst_14 [1] : vector<112x200xf32> to vector<112xf32>
    %20 = vector.shape_cast %19 : vector<112xf32> to vector<112x1xf32>
    %cst_15 = arith.constant 5.000000e-01 : f32
    %21 = vector.broadcast %cst_15 : f32 to vector<112x1xf32>
    %22 = arith.mulf %21, %20 : vector<112x1xf32>
    %c0_16 = arith.constant 0 : index
    %c0_17 = arith.constant 0 : index
    %23 = vector.load %arg7[%c0_16, %c0_17] : memref<1x1xf32, #tpu.memory_space<vmem>>, vector<1x1xf32>
    %24 = vector.broadcast %23 : vector<1x1xf32> to vector<112x1xf32>
    %25 = arith.addf %22, %24 : vector<112x1xf32>
    %cst_18 = arith.constant 0.000000e+00 : f32
    %26 = vector.broadcast %cst_18 : f32 to vector<112x1xf32>
    %27 = arith.maximumf %25, %26 : vector<112x1xf32>
    %28 = vector.broadcast %cst_18 : f32 to vector<112x1xf32>
    %29 = arith.subf %25, %28 : vector<112x1xf32>
    %30 = arith.cmpf one, %29, %29 : vector<112x1xf32>
    %31 = vector.broadcast %cst_18 : f32 to vector<112x1xf32>
    %32 = arith.addf %25, %31 : vector<112x1xf32>
    %33 = math.absf %29 : vector<112x1xf32>
    %cst_19 = arith.constant 0.000000e+00 : f32
    %34 = vector.broadcast %cst_19 : f32 to vector<112x1xf32>
    %35 = arith.subf %34, %33 : vector<112x1xf32>
    %36 = math.exp %35 : vector<112x1xf32>
    %37 = math.log1p %36 : vector<112x1xf32>
    %38 = arith.addf %27, %37 : vector<112x1xf32>
    %39 = arith.select %30, %32, %38 : vector<112x1xi1>, vector<112x1xf32>
    %c0_20 = arith.constant 0 : index
    %c0_21 = arith.constant 0 : index
    %40 = vector.load %arg8[%c0_20, %c0_21] : memref<112x1xf32, #tpu.memory_space<vmem>>, vector<112x1xf32>
    tpu.vector_store %arg8[%c0_20, %c0_21], %39 {strides = array<i32>} : memref<112x1xf32, #tpu.memory_space<vmem>>, vector<112x1xf32>,
    return
  }
  func.func @transform_0(%arg0: i32) -> (i32, i32) {
    %c0_i32 = arith.constant 0 : i32
    %c0_i32_0 = arith.constant 0 : i32
    return %arg0, %c0_i32 : i32, i32
  }
  func.func @transform_1(%arg0: i32) -> (i32, i32) {
    %c0_i32 = arith.constant 0 : i32
    %c0_i32_0 = arith.constant 0 : i32
    %c0_i32_1 = arith.constant 0 : i32
    return %c0_i32, %c0_i32_0 : i32, i32
  }
  func.func @transform_2(%arg0: i32) -> (i32, i32) {
    %c0_i32 = arith.constant 0 : i32
    %c0_i32_0 = arith.constant 0 : i32
    %c0_i32_1 = arith.constant 0 : i32
    return %c0_i32, %c0_i32_0 : i32, i32
  }
  func.func @transform_3(%arg0: i32) -> (i32, i32) {
    %c0_i32 = arith.constant 0 : i32
    %c0_i32_0 = arith.constant 0 : i32
    %c0_i32_1 = arith.constant 0 : i32
    return %c0_i32, %c0_i32_0 : i32, i32
  }
  func.func @transform_4(%arg0: i32) -> (i32, i32) {
    %c0_i32 = arith.constant 0 : i32
    %c0_i32_0 = arith.constant 0 : i32
    %c0_i32_1 = arith.constant 0 : i32
    return %c0_i32, %c0_i32_0 : i32, i32
  }
  func.func @transform_5(%arg0: i32) -> (i32, i32) {
    %c0_i32 = arith.constant 0 : i32
    %c0_i32_0 = arith.constant 0 : i32
    %c0_i32_1 = arith.constant 0 : i32
    return %c0_i32, %c0_i32_0 : i32, i32
  }
  func.func @transform_6(%arg0: i32) -> (i32, i32) {
    %c0_i32 = arith.constant 0 : i32
    %c0_i32_0 = arith.constant 0 : i32
    %c0_i32_1 = arith.constant 0 : i32
    return %c0_i32, %c0_i32_0 : i32, i32
  }
  func.func @transform_7(%arg0: i32) -> (i32, i32) {
    %c0_i32 = arith.constant 0 : i32
    %c0_i32_0 = arith.constant 0 : i32
    return %arg0, %c0_i32 : i32, i32
  }
}

</mosaic_0001>

<bundles_post_ra>
// kernel: _mlp_forward.1
= control target key start
LH: loop header
LB: loop body
LE: loop exit
PB: predicated region body
PF: predicated region fallthrough
CT: control target
= control target key end

     0   :  { %s2642_s26 = smov 0   ;;  %s3493_s0 = inlined_call_operand.vmem [shape: bf16[224,32], index: 0, kind: input, shape index: {}]   ;;  %s3494_s1 = inlined_call_operand.vmem [shape: bf16[32,600], index: 1, kind: input, shape index: {}]   ;;  %s3495_s2 = inlined_call_operand.vmem [shape: f32[1,600], index: 2, kind: input, shape index: {}]   ;;  %s3496_s3 = inlined_call_operand.vmem [shape: bf16[600,200], index: 3, kind: input, shape index: {}]   ;;  %s3497_s4 = inlined_call_operand.vmem [shape: f32[1,200], index: 4, kind: input, shape index: {}]   ;;  %s3498_s5 = inlined_call_operand.vmem [shape: f32[1,200], index: 5, kind: input, shape index: {}]   ;;  %s3499_s6 = inlined_call_operand.<no memory space> [shape: f32[1,1], index: 6, kind: input, shape index: {}]   ;;  %s3500_s7 = inlined_call_operand.vmem [shape: f32[224,1], index: 7, kind: output, shape index: {}]  }
   0x1   :  { %v12_v0 = vstv %s3499_s6 }
   0x2   :  { %13 = vst [vmem:[#allocation2] sm:$0x1] %v12_v0 }
   0x3 LB: > { %s2130_s27 = sadd.s32 4294967295, %s2594_s26   ;;  %p2134_p0 = scmp.ge.s32.totalorder %s2594_s26, 1  ;;  %s2594_s26 = sphi %s2642_s26, %s19_s26  }
   0x4   : > { %p240_p1 = scmp.lt.s32.totalorder %s2594_s26, 3 }
   0x6   : > { %p241_p2 = pnand %p2134_p0, %p240_p1 }
   0x7   : > { %v2398_v1 = vld [vmem:[%s3494_s1 + $0x4] ss:$20 sps:$4 sm:$0xff] (!%p241_p2)   ;;  %s272_s6 = smul.u32 (!%p241_p2), 14, %s2130_s27  ;;  %v2400_v2 = vld [vmem:[%s3494_s1 + $0xc] ss:$20 sps:$4 sm:$0xff] (!%p241_p2)   ;;  %v2596_v3 = vmov (!%p241_p2), 0  }
   0x8   : > { %244 = sbr.rel (%p241_p2) target bundleno = 757 (0x2f5), region = 48  ;;  %479 = vmatprep.mubr.bf16.mxu0 (!%p241_p2), %v2596_v3  ;;  %582 = vmatprep.mubr.bf16.mxu1 (!%p241_p2), %v2596_v3  ;;  %v2402_v4 = vld [vmem:[%s3494_s1] ss:$20 sps:$4 sm:$0xff] (!%p241_p2)   ;;  %v2403_v5 = vld [vmem:[%s3494_s1 + $0x8] ss:$20 sps:$4 sm:$0xff] (!%p241_p2)   ;;  %vm425_vm0 = vcmask (!%p241_p2), 261120  }
   0x9   : > { %447 = vmatprep.subr.bf16.mxu0 (!%p241_p2), %v2398_v1  ;;  %p273_p3 = scmp.lt.s32.totalorder (!%p241_p2), %s272_s6, 27  ;;  %550 = vmatprep.subr.bf16.mxu1 (!%p241_p2), %v2400_v2  ;;  %v2404_v6 = vld [vmem:[%s3494_s1 + $0x2c] ss:$20 sps:$4 sm:$0xff] (!%p241_p2)   ;;  %v2406_v7 = vld [vmem:[%s3494_s1 + $0x34] ss:$20 sps:$4 sm:$0xff] (!%p241_p2)   ;;  %v2597_v12 = vmov (!%p241_p2), 0.0  }
   0xa   : > { %448 = vmatpush1.bf16.msra.mxu0 (!%p241_p2), %v2402_v4  ;;  %551 = vmatpush1.bf16.msra.mxu1 (!%p241_p2), %v2403_v5  ;;  %v2408_v8 = vld [vmem:[%s3494_s1 + $0x28] ss:$20 sps:$4 sm:$0xff] (!%p241_p2)   ;;  %v2409_v9 = vld [vmem:[%s3494_s1 + $0x30] ss:$20 sps:$4 sm:$0xff] (!%p241_p2)   ;;  %v2415_v13 = vld [vmem:[%s3494_s1 + $0x38] ss:$20 sps:$4 sm:$0xff] (!%p241_p2)  }
   0xb   : > { %449 = vmatprep.subr.bf16.mxu0 (!%p241_p2), %v2404_v6  ;;  %552 = vmatprep.subr.bf16.mxu1 (!%p241_p2), %v2406_v7  ;;  %v2411_v10 = vld [vmem:[%s3494_s1 + $0x10] ss:$20 sps:$4 sm:$0xff] (!%p241_p2)   ;;  %v2419_v15 = vld [vmem:[%s3496_s3 + $0x100] ss:$8 sps:$4 sm:$0xff] (!%p241_p2)   ;;  %v2427_v19 = vld [vmem:[%s3496_s3 + $0x114] ss:$8 sps:$4 sm:$0xff] (!%p241_p2)  }
   0xc   : > { %v2421_v16 = vld [vmem:[%s3496_s3 + $0x104] ss:$8 sps:$4 sm:$0xff] (!%p241_p2)   ;;  %v2425_v18 = vld [vmem:[%s3496_s3 + $0x110] ss:$8 sps:$4 sm:$0xff] (!%p241_p2)   ;;  %v2431_v21 = vld [vmem:[%s3496_s3 + $0x120] ss:$8 sps:$4 sm:$0xff] (!%p241_p2)  }
   0xd   : > { %v2424_v17 = vld [vmem:[%s3496_s3 + $0x4] ss:$8 sps:$4 sm:$0xff] (!%p241_p2)   ;;  %v2439_v23 = vld [vmem:[%s3496_s3 + $0x134] ss:$8 sps:$4 sm:$0xff] (!%p241_p2)   ;;  %v2437_v24 = vld [vmem:[%s3496_s3 + $0x130] ss:$8 sps:$4 sm:$0xff] (!%p241_p2)  }
   0xe   : > { %450 = vmatpush1.bf16.msra.mxu0 (!%p241_p2), %v2408_v8  ;;  %553 = vmatpush1.bf16.msra.mxu1 (!%p241_p2), %v2409_v9  ;;  %v2433_v20 = vld [vmem:[%s3496_s3 + $0x124] ss:$8 sps:$4 sm:$0xff] (!%p241_p2)   ;;  %v2443_v26 = vld [vmem:[%s3496_s3 + $0x140] ss:$8 sps:$4 sm:$0xff] (!%p241_p2)   ;;  %v2451_v28 = vld [vmem:[%s3496_s3 + $0x154] ss:$8 sps:$4 sm:$0xff] (!%p241_p2)  }
   0xf   : > { %s3506_s6 = smov (!%p273_p3, %s272_s6), 27  ;;  %2271 = vmatprep.subr.bf16.mxu0 %v2597_v12  ;;  %1441 = vmatprep.subr.bf16.mxu1 %v2421_v16  ;;  %v2445_v25 = vld [vmem:[%s3496_s3 + $0x144] ss:$8 sps:$4 sm:$0xff]   ;;  %v2449_v29 = vld [vmem:[%s3496_s3 + $0x150] ss:$8 sps:$4 sm:$0xff]   ;;  %vm2598_vm1 = vmmov 0  }
  0x10   : > { %s2135_s21 = sshll.u32 %s3506_s6, 2  ;;  %v2457_v30 = vld [vmem:[%s3496_s3 + $0x164] ss:$8 sps:$4 sm:$0xff]   ;;  %v2455_v31 = vld [vmem:[%s3496_s3 + $0x160] ss:$8 sps:$4 sm:$0xff]   ;;  %vm1331_vm2 = vcmask 1043456  }
  0x11   : > { %s2682_s24 = scalar_lea.vmem %s3493_s0, %s2135_s21  ;;  %v2463_v33 = vld [vmem:[%s3496_s3 + $0x174] ss:$8 sps:$4 sm:$0xff]   ;;  %v2461_v34 = vld [vmem:[%s3496_s3 + $0x170] ss:$8 sps:$4 sm:$0xff]   ;;  %v2469_v35 = vld [vmem:[%s3496_s3 + $0x184] ss:$8 sps:$4 sm:$0xff]  }
  0x12   : > { %v2688_v11 = vld [vmem:[%s2682_s24] sm:$0xff]   ;;  %v2702_v14 = vld [vmem:[%s2682_s24 + $0x8] sm:$0xff]   ;;  %v2732_v22 = vld [vmem:[%s2682_s24 + $0x10] sm:$0xff]   ;;  %vm1309_vm3 = vcmask 719872   ;;  %vm1715_vm4 = vcmask 588800   ;;  %vm2059_vm5 = vcmask 7168  }
  0x13   : > { %2154 = vmatmul.mubr.msk.bf16.vlgmr.msra.gmra.mrb[0].mxu0 %vm425_vm0, %v2688_v11  ;;  %2161 = vmatmul.mubr.msk.bf16.vlgmr.msra.gmra.mrb[0].mxu1 %vm425_vm0, %v2688_v11  ;;  %v2753_v27 = vld [vmem:[%s2682_s24 + $0x18] sm:$0xff]   ;;  %v2774_v32 = vld [vmem:[%s2682_s24 + $0x20] sm:$0xff]   ;;  %v2795_v37 = vld [vmem:[%s2682_s24 + $0x28] sm:$0xff]   ;;  %s2136_s11 = sshll.u32 %s3506_s6, 3 }
  0x14   : > { %2272 = vmatpush3.bf16.msra.mxu0 %v2411_v10  ;;  %489 = vmatprep.mubr.bf16.mxu0 %v2596_v3  ;;  %v2467_v36 = vld [vmem:[%s3496_s3 + $0x180] ss:$8 sps:$4 sm:$0xff]   ;;  %v2475_v38 = vld [vmem:[%s3496_s3 + $0x194] ss:$8 sps:$4 sm:$0xff]   ;;  %v2473_v39 = vld [vmem:[%s3496_s3 + $0x190] ss:$8 sps:$4 sm:$0xff]   ;;  %s3339_s13 = scalar_lea.vmem %s3500_s7, %s2136_s11 }
  0x15   : > { %592 = vmatprep.mubr.bf16.mxu1 %v2596_v3  ;;  %2273 = vmatprep.subr.bf16.mxu0 %v2597_v12  ;;  %v2481_v40 = vld [vmem:[%s3496_s3 + $0x1a4] ss:$8 sps:$4 sm:$0xff]   ;;  %v2479_v41 = vld [vmem:[%s3496_s3 + $0x1a0] ss:$8 sps:$4 sm:$0xff]   ;;  %v2816_v42 = vld [vmem:[%s2682_s24 + $0x30] sm:$0xff]  }
  0x16   : > { %1442 = vmatpush1.bf16.msra.mxu1 %v2419_v15  ;;  %v2487_v43 = vld [vmem:[%s3496_s3 + $0x1b4] ss:$8 sps:$4 sm:$0xff]   ;;  %v2485_v44 = vld [vmem:[%s3496_s3 + $0x1b0] ss:$8 sps:$4 sm:$0xff]   ;;  %v2493_v45 = vld [vmem:[%s3496_s3 + $0x1c4] ss:$8 sps:$4 sm:$0xff]  }
  0x17   : > { %1443 = vmatprep.subr.bf16.mxu1 %v2427_v19  ;;  %v2491_v46 = vld [vmem:[%s3496_s3 + $0x1c0] ss:$8 sps:$4 sm:$0xff]   ;;  %v2499_v47 = vld [vmem:[%s3496_s3 + $0x1d4] ss:$8 sps:$4 sm:$0xff]   ;;  %v2497_v50 = vld [vmem:[%s3496_s3 + $0x1d0] ss:$8 sps:$4 sm:$0xff]  }
  0x18   : > { %2274 = vmatpush3.bf16.msra.mxu0 %v2415_v13  ;;  %v2422_v48 = vld [vmem:[%s3496_s3] ss:$8 sps:$4 sm:$0xff]   ;;  %v2430_v49 = vld [vmem:[%s3496_s3 + $0x14] ss:$8 sps:$4 sm:$0xff]   ;;  %v2428_v51 = vld [vmem:[%s3496_s3 + $0x10] ss:$8 sps:$4 sm:$0xff]  }
  0x19   : > { %1338 = vmatprep.subr.bf16.mxu0 %v2424_v17  ;;  %v2436_v52 = vld [vmem:[%s3496_s3 + $0x24] ss:$8 sps:$4 sm:$0xff]   ;;  %v2434_v53 = vld [vmem:[%s3496_s3 + $0x20] ss:$8 sps:$4 sm:$0xff]   ;;  %v2442_v54 = vld [vmem:[%s3496_s3 + $0x34] ss:$8 sps:$4 sm:$0xff]  }
  0x1a   : > { %1444 = vmatpush1.bf16.msra.mxu1 %v2425_v18  ;;  %v2440_v55 = vld [vmem:[%s3496_s3 + $0x30] ss:$8 sps:$4 sm:$0xff]   ;;  %v2448_v56 = vld [vmem:[%s3496_s3 + $0x44] ss:$8 sps:$4 sm:$0xff]   ;;  %v2446_v57 = vld [vmem:[%s3496_s3 + $0x40] ss:$8 sps:$4 sm:$0xff]  }
  0x1b   : > { %2155 = vmatmul.mubr.msk.bf16.gmra.mrb[4].mxu0 %vm425_vm0, %v2702_v14  ;;  %2162 = vmatmul.mubr.msk.bf16.gmra.mrb[4].mxu1 %vm425_vm0, %v2702_v14  ;;  %v2454_v58 = vld [vmem:[%s3496_s3 + $0x54] ss:$8 sps:$4 sm:$0xff]   ;;  %v2452_v59 = vld [vmem:[%s3496_s3 + $0x50] ss:$8 sps:$4 sm:$0xff]   ;;  %v2460_v60 = vld [vmem:[%s3496_s3 + $0x64] ss:$8 sps:$4 sm:$0xff]  }
  0x1c   : > { %499 = vmatprep.mubr.bf16.mxu0 %v2596_v3  ;;  %602 = vmatprep.mubr.bf16.mxu1 %v2596_v3  ;;  %v2458_v61 = vld [vmem:[%s3496_s3 + $0x60] ss:$8 sps:$4 sm:$0xff]   ;;  %v2466_v62 = vld [vmem:[%s3496_s3 + $0x74] ss:$8 sps:$4 sm:$0xff]   ;;  %v2464_v63 = vld [vmem:[%s3496_s3 + $0x70] ss:$8 sps:$4 sm:$0xff]  }
  0x1d   : > { %1445 = vmatprep.subr.bf16.mxu1 %v2433_v20  ;;  %v2472_v0 = vld [vmem:[%s3496_s3 + $0x84] ss:$8 sps:$4 sm:$0xff]   ;;  %v2470_v2 = vld [vmem:[%s3496_s3 + $0x80] ss:$8 sps:$4 sm:$0xff]   ;;  %v2478_v5 = vld [vmem:[%s3496_s3 + $0x94] ss:$8 sps:$4 sm:$0xff]  }
  0x1e   : > { %1446 = vmatpush1.bf16.msra.mxu1 %v2431_v21  ;;  %v2505_v1 = vld [vmem:[%s3496_s3 + $0x1e4] ss:$8 sps:$4 sm:$0xff]   ;;  %v2503_v4 = vld [vmem:[%s3496_s3 + $0x1e0] ss:$8 sps:$4 sm:$0xff]   ;;  %v2511_v6 = vld [vmem:[%s3496_s3 + $0x1f4] ss:$8 sps:$4 sm:$0xff]  }
  0x1f   : > { %1447 = vmatprep.subr.bf16.mxu1 %v2439_v23  ;;  %v2476_v7 = vld [vmem:[%s3496_s3 + $0x90] ss:$8 sps:$4 sm:$0xff]   ;;  %v2484_v9 = vld [vmem:[%s3496_s3 + $0xa4] ss:$8 sps:$4 sm:$0xff]   ;;  %v2482_v10 = vld [vmem:[%s3496_s3 + $0xa0] ss:$8 sps:$4 sm:$0xff]  }
  0x20   : > { %v2509_v8 = vld [vmem:[%s3496_s3 + $0x1f0] ss:$8 sps:$4 sm:$0xff]   ;;  %v2517_v15 = vld [vmem:[%s3496_s3 + $0x204] ss:$8 sps:$4 sm:$0xff]   ;;  %v2502_v16 = vld [vmem:[%s3496_s3 + $0xd4] ss:$8 sps:$4 sm:$0xff]  }
  0x21   : > { %v2488_v13 = vld [vmem:[%s3496_s3 + $0xb0] ss:$8 sps:$4 sm:$0xff]   ;;  %v2508_v18 = vld [vmem:[%s3496_s3 + $0xe4] ss:$8 sps:$4 sm:$0xff]   ;;  %v2506_v19 = vld [vmem:[%s3496_s3 + $0xe0] ss:$8 sps:$4 sm:$0xff]  }
  0x22   : > { %1448 = vmatpush1.bf16.msra.mxu1 %v2437_v24  ;;  %v2500_v17 = vld [vmem:[%s3496_s3 + $0xd0] ss:$8 sps:$4 sm:$0xff]   ;;  %v2514_v20 = vld [vmem:[%s3496_s3 + $0xf4] ss:$8 sps:$4 sm:$0xff]  }
  0x23   : > { %2156 = vmatmul.mubr.msk.bf16.gmra.mrb[8].mxu0 %vm425_vm0, %v2732_v22  ;;  %2163 = vmatmul.mubr.msk.bf16.gmra.mrb[8].mxu1 %vm425_vm0, %v2732_v22  ;;  %v2512_v21 = vld [vmem:[%s3496_s3 + $0xf0] ss:$8 sps:$4 sm:$0xff]  }
  0x24   : > { %509 = vmatprep.mubr.bf16.mxu0 %v2596_v3  ;;  %612 = vmatprep.mubr.bf16.mxu1 %v2596_v3 }
  0x25   : > { %1449 = vmatprep.subr.bf16.mxu1 %v2445_v25 }
  0x26   : > { %1450 = vmatpush1.bf16.msra.mxu1 %v2443_v26  ;;  %v2985_v26 = vld [vmem:[%s3495_s2] sm:$0x1f] }
  0x27   : > { %1451 = vmatprep.subr.bf16.mxu1 %v2451_v28 }
  0x2a   : > { %1452 = vmatpush1.bf16.msra.mxu1 %v2449_v29 }
  0x2b   : > { %2157 = vmatmul.mubr.msk.bf16.gmra.mrb[12].mxu0 %vm425_vm0, %v2753_v27  ;;  %2164 = vmatmul.mubr.msk.bf16.gmra.mrb[12].mxu1 %vm425_vm0, %v2753_v27 }
  0x2c   : > { %519 = vmatprep.mubr.bf16.mxu0 %v2596_v3  ;;  %622 = vmatprep.mubr.bf16.mxu1 %v2596_v3 }
  0x2d   : > { %1453 = vmatprep.subr.bf16.mxu1 %v2457_v30 }
  0x2e   : > { %1454 = vmatpush1.bf16.msra.mxu1 %v2455_v31 }
  0x2f   : > { %1455 = vmatprep.subr.bf16.mxu1 %v2463_v33 }
  0x32   : > { %1456 = vmatpush1.bf16.msra.mxu1 %v2461_v34 }
  0x33   : > { %2158 = vmatmul.mubr.msk.bf16.gmra.mrb[16].mxu0 %vm425_vm0, %v2774_v32  ;;  %2165 = vmatmul.mubr.msk.bf16.gmra.mrb[16].mxu1 %vm425_vm0, %v2774_v32 }
  0x34   : > { %529 = vmatprep.mubr.bf16.mxu0 %v2596_v3  ;;  %632 = vmatprep.mubr.bf16.mxu1 %v2596_v3 }
  0x35   : > { %1457 = vmatprep.subr.bf16.mxu1 %v2469_v35 }
  0x36   : > { %1458 = vmatpush1.bf16.msra.mxu1 %v2467_v36 }
  0x37   : > { %1459 = vmatprep.subr.bf16.mxu1 %v2475_v38 }
  0x3a   : > { %1460 = vmatpush1.bf16.msra.mxu1 %v2473_v39 }
  0x3b   : > { %2159 = vmatmul.mubr.msk.bf16.gmra.mrb[20].mxu0 %vm425_vm0, %v2795_v37  ;;  %2166 = vmatmul.mubr.msk.bf16.gmra.mrb[20].mxu1 %vm425_vm0, %v2795_v37 }
  0x3c   : > { %539 = vmatprep.mubr.bf16.mxu0 %v2596_v3  ;;  %642 = vmatprep.mubr.bf16.mxu1 %v2596_v3 }
  0x3d   : > { %1461 = vmatprep.subr.bf16.mxu1 %v2481_v40 }
  0x3e   : > { %1462 = vmatpush1.bf16.msra.mxu1 %v2479_v41 }
  0x3f   : > { %1463 = vmatprep.subr.bf16.mxu1 %v2487_v43 }
  0x42   : > { %1464 = vmatpush1.bf16.msra.mxu1 %v2485_v44 }
  0x43   : > { %2160 = vmatmul.mubr.msk.bf16.gmra.mrb[24].mxu0 %vm425_vm0, %v2816_v42  ;;  %2167 = vmatmul.mubr.msk.bf16.gmra.mrb[24].mxu1 %vm425_vm0, %v2816_v42 }
  0x44   : > { %2275 = vmatprep.mubr.msk.bf16.mxu0 %vm2598_vm1, %v2597_v12  ;;  %1465 = vmatprep.subr.bf16.mxu1 %v2493_v45 }
  0x46   : > { %1466 = vmatpush1.bf16.msra.mxu1 %v2491_v46 }
  0x47   : > { %1467 = vmatprep.subr.bf16.mxu1 %v2499_v47 }
  0x4a   : > { %1468 = vmatpush1.bf16.msra.mxu1 %v2497_v50 }
  0x4b   : > { %2276 = vmatmul.mubr.msk.bf16.vlgmr.msra.gmra.mrb[28].mxu0 %vm425_vm0, %v2688_v11  ;;  %1469 = vmatprep.subr.bf16.mxu1 %v2505_v1  ;;  %v2490_v11 = vld [vmem:[%s3496_s3 + $0xb4] ss:$8 sps:$4 sm:$0xff]  }
  0x4c   : > { %2279 = vmatprep.mubr.msk.bf16.mxu0 %vm2598_vm1, %v2597_v12  ;;  %1339 = vmatpush1.bf16.msra.mxu0 %v2422_v48 }
  0x4d   : > { %1340 = vmatprep.subr.bf16.mxu0 %v2430_v49 }
  0x4e   : > { %1470 = vmatpush1.bf16.msra.mxu1 %v2503_v4 }
  0x4f   : > { %1471 = vmatprep.subr.bf16.mxu1 %v2511_v6 }
  0x50   : > { %1341 = vmatpush1.bf16.msra.mxu0 %v2428_v51 }
  0x51   : > { %1342 = vmatprep.subr.bf16.mxu0 %v2436_v52 }
  0x52   : > { %1472 = vmatpush1.bf16.msra.mxu1 %v2509_v8 }
  0x53   : > { %2280 = vmatmul.mubr.msk.bf16.gmra.mrb[32].mxu0 %vm425_vm0, %v2702_v14  ;;  %v2496_v14 = vld [vmem:[%s3496_s3 + $0xc4] ss:$8 sps:$4 sm:$0xff]   ;;  %1544 = vmatprep.subr.bf16.mxu1 %v2517_v15 }
  0x54   : > { %2283 = vmatprep.mubr.msk.bf16.mxu0 %vm2598_vm1, %v2597_v12  ;;  %1343 = vmatpush1.bf16.msra.mxu0 %v2434_v53 }
  0x55   : > { %1344 = vmatprep.subr.bf16.mxu0 %v2442_v54 }
  0x58   : > { %1345 = vmatpush1.bf16.msra.mxu0 %v2440_v55 }
  0x59   : > { %1346 = vmatprep.subr.bf16.mxu0 %v2448_v56 }
  0x5b   : > { %2284 = vmatmul.mubr.msk.bf16.gmra.mrb[36].mxu0 %vm425_vm0, %v2732_v22  ;;  %v313_v22 = vlaneseq }
  0x5c   : > { %2287 = vmatprep.mubr.msk.bf16.mxu0 %vm2598_vm1, %v2597_v12  ;;  %1347 = vmatpush1.bf16.msra.mxu0 %v2446_v57 }
  0x5d   : > { %1348 = vmatprep.subr.bf16.mxu0 %v2454_v58  ;;  %v2976_v23 = vshrl.u32 %v313_v22, 7  ;;  %v2523_v22 = vld [vmem:[%s3496_s3 + $0x224] ss:$8 sps:$4 sm:$0xff]  }
  0x5f   : > { %v2979_v24 = vsub.s32 0, %v2976_v23  ;;  %v323_v25 = vsub.s32 2, %v2976_v23  ;;  %v327_v28 = vsub.s32 3, %v2976_v23 }
  0x60   : > { %1349 = vmatpush1.bf16.msra.mxu0 %v2452_v59 }
  0x61   : > { %1350 = vmatprep.subr.bf16.mxu0 %v2460_v60  ;;  %v2993_v29 = vrot.slane %v2985_v26, %v2979_v24  ;;  %v2996_v30 = vrot.slane %v2985_v26, %v323_v25 }
  0x63   : > { %2288 = vmatmul.mubr.msk.bf16.gmra.mrb[40].mxu0 %vm425_vm0, %v2753_v27  ;;  %v2988_v27 = vsub.s32 1, %v2976_v23 }
  0x64   : > { %2291 = vmatprep.mubr.msk.bf16.mxu0 %vm2598_vm1, %v2597_v12  ;;  %1351 = vmatpush1.bf16.msra.mxu0 %v2458_v61 }
  0x65   : > { %1352 = vmatprep.subr.bf16.mxu0 %v2466_v62  ;;  %v3000_v31 = vrot.slane %v2985_v26, %v2988_v27 }
  0x68   : > { %1353 = vmatpush1.bf16.msra.mxu0 %v2464_v63  ;;  %v2515_v63 = vld [vmem:[%s3496_s3 + $0x200] ss:$8 sps:$4 sm:$0xff]  }
  0x69   : > { %1354 = vmatprep.subr.bf16.mxu0 %v2472_v0 }
  0x6b   : > { %2292 = vmatmul.mubr.msk.bf16.gmra.mrb[44].mxu0 %vm425_vm0, %v2774_v32  ;;  %v3003_v32 = vrot.slane %v2985_v26, %v327_v28 }
  0x6c   : > { %2295 = vmatprep.mubr.msk.bf16.mxu0 %vm2598_vm1, %v2597_v12  ;;  %1355 = vmatpush1.bf16.msra.mxu0 %v2470_v2 }
  0x6d   : > { %1356 = vmatprep.subr.bf16.mxu0 %v2478_v5  ;;  %v2520_v5 = vld [vmem:[%s3496_s3 + $0x214] ss:$8 sps:$4 sm:$0xff]  }
  0x70   : > { %1357 = vmatpush1.bf16.msra.mxu0 %v2476_v7 }
  0x71   : > { %1358 = vmatprep.subr.bf16.mxu0 %v2484_v9 }
  0x73   : > { %2296 = vmatmul.mubr.msk.bf16.gmra.mrb[48].mxu0 %vm425_vm0, %v2795_v37 }
  0x74   : > { %2299 = vmatprep.mubr.msk.bf16.mxu0 %vm2598_vm1, %v2597_v12  ;;  %1359 = vmatpush1.bf16.msra.mxu0 %v2482_v10  ;;  %v2494_v12 = vld [vmem:[%s3496_s3 + $0xc0] ss:$8 sps:$4 sm:$0xff]  }
  0x75   : > { %1360 = vmatprep.subr.bf16.mxu0 %v2490_v11 }
  0x78   : > { %1361 = vmatpush1.bf16.msra.mxu0 %v2488_v13 }
  0x79   : > { %1362 = vmatprep.subr.bf16.mxu0 %v2496_v14 }
  0x7b   : > { %2300 = vmatmul.mubr.msk.bf16.gmra.mrb[52].mxu0 %vm425_vm0, %v2816_v42 }
  0x7c   : > { %1363 = vmatpush1.bf16.msra.mxu0 %v2494_v12 }
  0x7d   : > { %1364 = vmatprep.subr.bf16.mxu0 %v2502_v16 }
  0x80   : > { %1365 = vmatpush1.bf16.msra.mxu0 %v2500_v17 }
  0x81   : > { %1366 = vmatprep.subr.bf16.mxu0 %v2508_v18  ;;  %v2518_v18 = vld [vmem:[%s3496_s3 + $0x210] ss:$8 sps:$4 sm:$0xff]  }
  0x84   : > { %1367 = vmatpush1.bf16.msra.mxu0 %v2506_v19 }
  0x85   : > { %1368 = vmatprep.subr.bf16.mxu0 %v2514_v20 }
  0x88   : > { %1369 = vmatpush1.bf16.msra.mxu0 %v2512_v21 }
  0xe6   : > { %v481_v33 = vpop.f32.mrb[0].mxu0  ;;  %v584_v34 = vpop.f32.mrb[0].mxu1 }
  0xe7   : > { %v482_v35 = vadd.f32 %v481_v33, %v2993_v29  ;;  %v585_v36 = vadd.f32 %v584_v34, %v2996_v30  ;;  %v483_v37 = vpop.f32.mrb[1].mxu0  ;;  %v586_v38 = vpop.f32.mrb[1].mxu1 }
  0xe8   : > { %v484_v39 = vadd.f32 %v483_v37, %v3000_v31  ;;  %v587_v40 = vadd.f32 %v586_v38, %v3003_v32  ;;  %v485_v41 = vpop.f32.mrb[2].mxu0  ;;  %v588_v42 = vpop.f32.mrb[2].mxu1 }
  0xe9   : > { %v742_v43 = vmax.f32 %v482_v35, 0.0  ;;  %v486_v44 = vadd.f32 %v485_v41, %v2993_v29  ;;  %v589_v45 = vadd.f32 %v588_v42, %v2996_v30  ;;  %v487_v46 = vpop.f32.mrb[3].mxu0  ;;  %v590_v47 = vpop.f32.mrb[3].mxu1  ;;  %v744_v51 = vmax.f32 %v585_v36, 0.0 }
  0xea   : > { %v743_v48 = vmax.f32 %v484_v39, 0.0  ;;  %v488_v49 = vadd.f32 %v487_v46, %v3000_v31  ;;  %v591_v50 = vadd.f32 %v590_v47, %v3003_v32  ;;  %v745_v54 = vmax.f32 %v587_v40, 0.0  ;;  %v2521_v40 = vld [vmem:[%s3496_s3 + $0x220] ss:$8 sps:$4 sm:$0xff]  }
  0xeb   : > { %v747_v52 = vmax.f32 %v486_v44, 0.0  ;;  %v749_v53 = vmax.f32 %v589_v45, 0.0  ;;  %v2526_v45 = vld [vmem:[%s3496_s3 + $0x234] ss:$8 sps:$4 sm:$0xff]  }
  0xec   : > { %v748_v55 = vmax.f32 %v488_v49, 0.0  ;;  %v750_v56 = vmax.f32 %v591_v50, 0.0 }
  0xed   : > { %v812_v57 = vpack.c.bf16 %v747_v52, %v742_v43  ;;  %v814_v58 = vpack.c.bf16 %v749_v53, %v744_v51 }
  0xee   : > { %v813_v59 = vpack.c.bf16 %v748_v55, %v743_v48  ;;  %v815_v60 = vpack.c.bf16 %v750_v56, %v745_v54  ;;  %v491_v61 = vpop.f32.mrb[4].mxu0  ;;  %v594_v62 = vpop.f32.mrb[4].mxu1 }
  0xef   : > { %v492_v0 = vadd.f32 %v491_v61, %v2993_v29  ;;  %v595_v1 = vadd.f32 %v594_v62, %v2996_v30  ;;  %v493_v2 = vpop.f32.mrb[5].mxu0  ;;  %v596_v4 = vpop.f32.mrb[5].mxu1  ;;  %v2529_v62 = vld [vmem:[%s3496_s3 + $0x244] ss:$8 sps:$4 sm:$0xff]  }
  0xf0   : > { %v494_v6 = vadd.f32 %v493_v2, %v3000_v31  ;;  %v597_v7 = vadd.f32 %v596_v4, %v3003_v32  ;;  %v495_v8 = vpop.f32.mrb[6].mxu0  ;;  %v598_v9 = vpop.f32.mrb[6].mxu1  ;;  %1370 = vmatprep.mubr.bf16.mxu0 %v813_v59  ;;  %1473 = vmatprep.mubr.bf16.mxu1 %v815_v60  ;;  %v921_v2 = vld [vmem:[%s3496_s3 + $0x250] sm:$0xff] }
  0xf1   : > { %v752_v10 = vmax.f32 %v492_v0, 0.0  ;;  %v496_v11 = vadd.f32 %v495_v8, %v2993_v29  ;;  %v599_v13 = vadd.f32 %v598_v9, %v2996_v30  ;;  %v497_v14 = vpop.f32.mrb[7].mxu0  ;;  %v600_v15 = vpop.f32.mrb[7].mxu1  ;;  %1371 = vmatmul.mubr.bf16.vlgmr.msra.gmra.mrb[56].mxu0 %v812_v57  ;;  %1474 = vmatmul.mubr.bf16.vlgmr.msra.gmra.mrb[28].mxu1 %v814_v58  ;;  %v754_v19 = vmax.f32 %v595_v1, 0.0  ;;  %v2524_v58 = vld [vmem:[%s3496_s3 + $0x230] ss:$8 sps:$4 sm:$0xff]  }
  0xf2   : > { %v753_v12 = vmax.f32 %v494_v6, 0.0  ;;  %v498_v16 = vadd.f32 %v497_v14, %v3000_v31  ;;  %v601_v17 = vadd.f32 %v600_v15, %v3003_v32  ;;  %1545 = vmatpush1.bf16.msra.mxu1 %v2515_v63  ;;  %v755_v25 = vmax.f32 %v597_v7, 0.0 }
  0xf3   : > { %v757_v20 = vmax.f32 %v496_v11, 0.0  ;;  %v759_v21 = vmax.f32 %v599_v13, 0.0  ;;  %1546 = vmatprep.subr.bf16.mxu1 %v2520_v5 }
  0xf4   : > { %v758_v28 = vmax.f32 %v498_v16, 0.0  ;;  %v760_v33 = vmax.f32 %v601_v17, 0.0  ;;  %v2249_v16 = vcombine.low %v921_v2, %v921_v2 }
  0xf5   : > { %v817_v34 = vpack.c.bf16 %v757_v20, %v752_v10  ;;  %v819_v35 = vpack.c.bf16 %v759_v21, %v754_v19  ;;  %v2527_v10 = vld [vmem:[%s3496_s3 + $0x240] ss:$8 sps:$4 sm:$0xff]  }
  0xf6   : > { %v818_v36 = vpack.c.bf16 %v758_v28, %v753_v12  ;;  %v820_v37 = vpack.c.bf16 %v760_v33, %v755_v25  ;;  %v501_v38 = vpop.f32.mrb[8].mxu0  ;;  %v604_v39 = vpop.f32.mrb[8].mxu1  ;;  %1547 = vmatpush1.bf16.msra.mxu1 %v2518_v18  ;;  %v2250_v12 = vcombine.high %v921_v2, %v921_v2 }
  0xf7   : > { %v502_v41 = vadd.f32 %v501_v38, %v2993_v29  ;;  %v605_v42 = vadd.f32 %v604_v39, %v2996_v30  ;;  %v503_v43 = vpop.f32.mrb[9].mxu0  ;;  %v606_v44 = vpop.f32.mrb[9].mxu1  ;;  %1548 = vmatprep.subr.bf16.mxu1 %v2523_v22 }
  0xf8   : > { %v504_v46 = vadd.f32 %v503_v43, %v3000_v31  ;;  %v607_v47 = vadd.f32 %v606_v44, %v3003_v32  ;;  %v505_v48 = vpop.f32.mrb[10].mxu0  ;;  %v608_v49 = vpop.f32.mrb[10].mxu1  ;;  %1380 = vmatprep.mubr.bf16.mxu0 %v818_v36  ;;  %1483 = vmatprep.mubr.bf16.mxu1 %v820_v37 }
  0xf9   : > { %v762_v50 = vmax.f32 %v502_v41, 0.0  ;;  %v506_v51 = vadd.f32 %v505_v48, %v2993_v29  ;;  %v609_v52 = vadd.f32 %v608_v49, %v2996_v30  ;;  %v507_v53 = vpop.f32.mrb[11].mxu0  ;;  %v610_v54 = vpop.f32.mrb[11].mxu1  ;;  %1381 = vmatmul.mubr.bf16.gmra.mrb[60].mxu0 %v817_v34  ;;  %1484 = vmatmul.mubr.bf16.gmra.mrb[32].mxu1 %v819_v35  ;;  %v764_v59 = vmax.f32 %v605_v42, 0.0 }
  0xfa   : > { %v763_v55 = vmax.f32 %v504_v46, 0.0  ;;  %v508_v56 = vadd.f32 %v507_v53, %v3000_v31  ;;  %v611_v57 = vadd.f32 %v610_v54, %v3003_v32  ;;  %1549 = vmatpush1.bf16.msra.mxu1 %v2521_v40  ;;  %v765_v63 = vmax.f32 %v607_v47, 0.0 }
  0xfb   : > { %v767_v60 = vmax.f32 %v506_v51, 0.0  ;;  %v769_v61 = vmax.f32 %v609_v52, 0.0  ;;  %1550 = vmatprep.subr.bf16.mxu1 %v2526_v45  ;;  %v1333_v40 = vsel %vm1331_vm2, %v2249_v16, 0 }
  0xfc   : > { %v768_v0 = vmax.f32 %v508_v56, 0.0  ;;  %v770_v1 = vmax.f32 %v611_v57, 0.0 }
  0xfd   : > { %v822_v4 = vpack.c.bf16 %v767_v60, %v762_v50  ;;  %v824_v5 = vpack.c.bf16 %v769_v61, %v764_v59 }
  0xfe   : > { %v823_v6 = vpack.c.bf16 %v768_v0, %v763_v55  ;;  %v825_v7 = vpack.c.bf16 %v770_v1, %v765_v63  ;;  %v511_v8 = vpop.f32.mrb[12].mxu0  ;;  %v614_v9 = vpop.f32.mrb[12].mxu1  ;;  %1551 = vmatpush1.bf16.msra.mxu1 %v2524_v58 }
  0xff   : > { %v512_v11 = vadd.f32 %v511_v8, %v2993_v29  ;;  %v615_v13 = vadd.f32 %v614_v9, %v2996_v30  ;;  %v513_v14 = vpop.f32.mrb[13].mxu0  ;;  %v616_v15 = vpop.f32.mrb[13].mxu1  ;;  %1552 = vmatprep.subr.bf16.mxu1 %v2529_v62 }
 0x100   : > { %v514_v17 = vadd.f32 %v513_v14, %v3000_v31  ;;  %v617_v18 = vadd.f32 %v616_v15, %v3003_v32  ;;  %v515_v19 = vpop.f32.mrb[14].mxu0  ;;  %v618_v20 = vpop.f32.mrb[14].mxu1  ;;  %1390 = vmatprep.mubr.bf16.mxu0 %v823_v6  ;;  %1493 = vmatprep.mubr.bf16.mxu1 %v825_v7 }
 0x101   : > { %v772_v21 = vmax.f32 %v512_v11, 0.0  ;;  %v516_v22 = vadd.f32 %v515_v19, %v2993_v29  ;;  %v619_v25 = vadd.f32 %v618_v20, %v2996_v30  ;;  %v517_v28 = vpop.f32.mrb[15].mxu0  ;;  %v620_v33 = vpop.f32.mrb[15].mxu1  ;;  %1391 = vmatmul.mubr.bf16.gmra.mrb[64].mxu0 %v822_v4  ;;  %1494 = vmatmul.mubr.bf16.gmra.mrb[36].mxu1 %v824_v5  ;;  %v774_v37 = vmax.f32 %v615_v13, 0.0 }
 0x102   : > { %v773_v34 = vmax.f32 %v514_v17, 0.0  ;;  %v518_v35 = vadd.f32 %v517_v28, %v3000_v31  ;;  %v621_v36 = vadd.f32 %v620_v33, %v3003_v32  ;;  %1553 = vmatpush1.bf16.msra.mxu1 %v2527_v10  ;;  %v775_v41 = vmax.f32 %v617_v18, 0.0 }
 0x103   : > { %v777_v38 = vmax.f32 %v516_v22, 0.0  ;;  %v779_v39 = vmax.f32 %v619_v25, 0.0  ;;  %2251 = vmatprep.subr.msk.bf16.mxu1 %vm1331_vm2, %v2250_v12 }
 0x104   : > { %v778_v42 = vmax.f32 %v518_v35, 0.0  ;;  %v780_v43 = vmax.f32 %v621_v36, 0.0 }
 0x105   : > { %v827_v44 = vpack.c.bf16 %v777_v38, %v772_v21  ;;  %v829_v45 = vpack.c.bf16 %v779_v39, %v774_v37 }
 0x106   : > { %v828_v46 = vpack.c.bf16 %v778_v42, %v773_v34  ;;  %v830_v47 = vpack.c.bf16 %v780_v43, %v775_v41  ;;  %v521_v48 = vpop.f32.mrb[16].mxu0  ;;  %v624_v49 = vpop.f32.mrb[16].mxu1  ;;  %1555 = vmatpush1.bf16.msra.mxu1 %v1333_v40 }
 0x107   : > { %v522_v50 = vadd.f32 %v521_v48, %v2993_v29  ;;  %v625_v51 = vadd.f32 %v624_v49, %v2996_v30  ;;  %v523_v52 = vpop.f32.mrb[17].mxu0  ;;  %v626_v53 = vpop.f32.mrb[17].mxu1 }
 0x108   : > { %v524_v54 = vadd.f32 %v523_v52, %v3000_v31  ;;  %v627_v55 = vadd.f32 %v626_v53, %v3003_v32  ;;  %v525_v56 = vpop.f32.mrb[18].mxu0  ;;  %v628_v57 = vpop.f32.mrb[18].mxu1  ;;  %1400 = vmatprep.mubr.bf16.mxu0 %v828_v46  ;;  %1503 = vmatprep.mubr.bf16.mxu1 %v830_v47 }
 0x109   : > { %v782_v58 = vmax.f32 %v522_v50, 0.0  ;;  %v526_v59 = vadd.f32 %v525_v56, %v2993_v29  ;;  %v629_v60 = vadd.f32 %v628_v57, %v2996_v30  ;;  %v527_v61 = vpop.f32.mrb[19].mxu0  ;;  %v630_v62 = vpop.f32.mrb[19].mxu1  ;;  %1401 = vmatmul.mubr.bf16.gmra.mrb[68].mxu0 %v827_v44  ;;  %1504 = vmatmul.mubr.bf16.gmra.mrb[40].mxu1 %v829_v45  ;;  %v784_v2 = vmax.f32 %v625_v51, 0.0 }
 0x10a   : > { %v783_v63 = vmax.f32 %v524_v54, 0.0  ;;  %v528_v0 = vadd.f32 %v527_v61, %v3000_v31  ;;  %v631_v1 = vadd.f32 %v630_v62, %v3003_v32  ;;  %v785_v6 = vmax.f32 %v627_v55, 0.0 }
 0x10b   : > { %v787_v4 = vmax.f32 %v526_v59, 0.0  ;;  %v789_v5 = vmax.f32 %v629_v60, 0.0  ;;  %v331_v55 = vsub.s32 4, %v2976_v23 }
 0x10c   : > { %v788_v7 = vmax.f32 %v528_v0, 0.0  ;;  %v790_v8 = vmax.f32 %v631_v1, 0.0 }
 0x10d   : > { %v832_v9 = vpack.c.bf16 %v787_v4, %v782_v58  ;;  %v834_v10 = vpack.c.bf16 %v789_v5, %v784_v2 }
 0x10e   : > { %v833_v11 = vpack.c.bf16 %v788_v7, %v783_v63  ;;  %v835_v13 = vpack.c.bf16 %v790_v8, %v785_v6  ;;  %v531_v14 = vpop.f32.mrb[20].mxu0  ;;  %v634_v15 = vpop.f32.mrb[20].mxu1  ;;  %v3095_v7 = vrot.slane %v2985_v26, %v331_v55 }
 0x10f   : > { %v532_v12 = vadd.f32 %v531_v14, %v2993_v29  ;;  %v635_v16 = vadd.f32 %v634_v15, %v2996_v30  ;;  %v533_v17 = vpop.f32.mrb[21].mxu0  ;;  %v636_v18 = vpop.f32.mrb[21].mxu1 }
 0x110   : > { %v534_v19 = vadd.f32 %v533_v17, %v3000_v31  ;;  %v637_v20 = vadd.f32 %v636_v18, %v3003_v32  ;;  %v535_v21 = vpop.f32.mrb[22].mxu0  ;;  %v638_v22 = vpop.f32.mrb[22].mxu1  ;;  %1410 = vmatprep.mubr.bf16.mxu0 %v833_v11  ;;  %1513 = vmatprep.mubr.bf16.mxu1 %v835_v13 }
 0x111   : > { %v792_v25 = vmax.f32 %v532_v12, 0.0  ;;  %v536_v28 = vadd.f32 %v535_v21, %v2993_v29  ;;  %v639_v33 = vadd.f32 %v638_v22, %v2996_v30  ;;  %v537_v34 = vpop.f32.mrb[23].mxu0  ;;  %v640_v35 = vpop.f32.mrb[23].mxu1  ;;  %1411 = vmatmul.mubr.bf16.gmra.mrb[72].mxu0 %v832_v9  ;;  %1514 = vmatmul.mubr.bf16.gmra.mrb[44].mxu1 %v834_v10  ;;  %v794_v39 = vmax.f32 %v635_v16, 0.0 }
 0x112   : > { %v793_v36 = vmax.f32 %v534_v19, 0.0  ;;  %v538_v37 = vadd.f32 %v537_v34, %v3000_v31  ;;  %v641_v38 = vadd.f32 %v640_v35, %v3003_v32  ;;  %v795_v42 = vmax.f32 %v637_v20, 0.0 }
 0x113   : > { %v797_v40 = vmax.f32 %v536_v28, 0.0  ;;  %v799_v41 = vmax.f32 %v639_v33, 0.0 }
 0x114   : > { %v798_v43 = vmax.f32 %v538_v37, 0.0  ;;  %v800_v44 = vmax.f32 %v641_v38, 0.0 }
 0x115   : > { %v837_v45 = vpack.c.bf16 %v797_v40, %v792_v25  ;;  %v839_v46 = vpack.c.bf16 %v799_v41, %v794_v39 }
 0x116   : > { %v838_v47 = vpack.c.bf16 %v798_v43, %v793_v36  ;;  %v840_v48 = vpack.c.bf16 %v800_v44, %v795_v42  ;;  %v541_v49 = vpop.f32.mrb[24].mxu0  ;;  %v644_v50 = vpop.f32.mrb[24].mxu1 }
 0x117   : > { %v542_v51 = vadd.f32 %v541_v49, %v2993_v29  ;;  %v645_v52 = vadd.f32 %v644_v50, %v2996_v30  ;;  %v543_v53 = vpop.f32.mrb[25].mxu0  ;;  %v646_v54 = vpop.f32.mrb[25].mxu1 }
 0x118   : > { %v544_v56 = vadd.f32 %v543_v53, %v3000_v31  ;;  %v647_v57 = vadd.f32 %v646_v54, %v3003_v32  ;;  %v545_v58 = vpop.f32.mrb[26].mxu0  ;;  %v648_v59 = vpop.f32.mrb[26].mxu1  ;;  %1420 = vmatprep.mubr.bf16.mxu0 %v838_v47  ;;  %1523 = vmatprep.mubr.bf16.mxu1 %v840_v48 }
 0x119   : > { %v802_v60 = vmax.f32 %v542_v51, 0.0  ;;  %v546_v61 = vadd.f32 %v545_v58, %v2993_v29  ;;  %v649_v62 = vadd.f32 %v648_v59, %v2996_v30  ;;  %v547_v63 = vpop.f32.mrb[27].mxu0  ;;  %v650_v0 = vpop.f32.mrb[27].mxu1  ;;  %1421 = vmatmul.mubr.bf16.gmra.mrb[76].mxu0 %v837_v45  ;;  %1524 = vmatmul.mubr.bf16.gmra.mrb[48].mxu1 %v839_v46  ;;  %v804_v4 = vmax.f32 %v645_v52, 0.0 }
 0x11a   : > { %v803_v1 = vmax.f32 %v544_v56, 0.0  ;;  %v548_v23 = vadd.f32 %v547_v63, %v3000_v31  ;;  %v651_v2 = vadd.f32 %v650_v0, %v3003_v32  ;;  %v805_v8 = vmax.f32 %v647_v57, 0.0 }
 0x11b   : > { %v807_v5 = vmax.f32 %v546_v61, 0.0  ;;  %v809_v6 = vmax.f32 %v649_v62, 0.0 }
 0x11c   : > { %v808_v9 = vmax.f32 %v548_v23, 0.0  ;;  %v810_v29 = vmax.f32 %v651_v2, 0.0 }
 0x11d   : > { %v842_v10 = vpack.c.bf16 %v807_v5, %v802_v60  ;;  %v844_v30 = vpack.c.bf16 %v809_v6, %v804_v4 }
 0x11e   : > { %v843_v11 = vpack.c.bf16 %v808_v9, %v803_v1  ;;  %v845_v13 = vpack.c.bf16 %v810_v29, %v805_v8  ;;  %v687_v14 = vpop.f32.mrb[28].mxu0 }
 0x11f   : > { %v688_v15 = vadd.f32 %v687_v14, %v3095_v7  ;;  %v2277_v12 = vpop.f32.mrb[29].mxu0 }
 0x120   : > { %v690_v31 = vpop.f32.mrb[30].mxu0  ;;  %1430 = vmatprep.mubr.bf16.mxu0 %v843_v11  ;;  %1533 = vmatprep.mubr.bf16.mxu1 %v845_v13 }
 0x121   : > { %v746_v32 = vmax.f32 %v688_v15, 0.0  ;;  %v691_v16 = vadd.f32 %v690_v31, %v3095_v7  ;;  %v2278_v17 = vpop.f32.mrb[31].mxu0  ;;  %1431 = vmatmul.mubr.bf16.gmra.mrb[80].mxu0 %v842_v10  ;;  %1534 = vmatmul.mubr.bf16.gmra.mrb[52].mxu1 %v844_v30 }
 0x122   : > { %1576 = vmatprep.mubr.bf16.mxu1 %v2596_v3 }
 0x123   : > { %v751_v26 = vmax.f32 %v691_v16, 0.0 }
 0x125   : > { %v816_v18 = vpack.c.bf16 %v751_v26, %v746_v32 }
 0x126   : > { %v695_v19 = vpop.f32.mrb[32].mxu0 }
 0x127   : > { %v696_v20 = vadd.f32 %v695_v19, %v3095_v7  ;;  %v2281_v21 = vpop.f32.mrb[33].mxu0 }
 0x128   : > { %v698_v22 = vpop.f32.mrb[34].mxu0 }
 0x129   : > { %v756_v25 = vmax.f32 %v696_v20, 0.0  ;;  %v699_v28 = vadd.f32 %v698_v22, %v3095_v7  ;;  %v2282_v33 = vpop.f32.mrb[35].mxu0  ;;  %2252 = vmatmul.mubr.msk.bf16.vlgmr.msra.gmra.mrb[28].mxu1 %vm1309_vm3, %v816_v18 }
 0x12a   : > { %1586 = vmatprep.mubr.bf16.mxu1 %v2596_v3 }
 0x12b   : > { %v761_v34 = vmax.f32 %v699_v28, 0.0 }
 0x12d   : > { %v821_v35 = vpack.c.bf16 %v761_v34, %v756_v25 }
 0x12e   : > { %v703_v36 = vpop.f32.mrb[36].mxu0 }
 0x12f   : > { %v704_v37 = vadd.f32 %v703_v36, %v3095_v7  ;;  %v2285_v38 = vpop.f32.mrb[37].mxu0 }
 0x130   : > { %v706_v39 = vpop.f32.mrb[38].mxu0 }
 0x131   : > { %v766_v40 = vmax.f32 %v704_v37, 0.0  ;;  %v707_v41 = vadd.f32 %v706_v39, %v3095_v7  ;;  %v2286_v42 = vpop.f32.mrb[39].mxu0  ;;  %2253 = vmatmul.mubr.msk.bf16.gmra.mrb[32].mxu1 %vm1309_vm3, %v821_v35 }
 0x132   : > { %1596 = vmatprep.mubr.bf16.mxu1 %v2596_v3 }
 0x133   : > { %v771_v43 = vmax.f32 %v707_v41, 0.0 }
 0x135   : > { %v826_v44 = vpack.c.bf16 %v771_v43, %v766_v40  ;;  %v922_v43 = vld [vmem:[%s3497_s4] sm:$0x3] }
 0x136   : > { %v711_v45 = vpop.f32.mrb[40].mxu0 }
 0x137   : > { %v712_v46 = vadd.f32 %v711_v45, %v3095_v7  ;;  %v2289_v47 = vpop.f32.mrb[41].mxu0 }
 0x138   : > { %v714_v48 = vpop.f32.mrb[42].mxu0  ;;  %v3167_v47 = vrot.slane %v922_v43, %v2979_v24 }
 0x139   : > { %v776_v49 = vmax.f32 %v712_v46, 0.0  ;;  %v715_v50 = vadd.f32 %v714_v48, %v3095_v7  ;;  %v2290_v51 = vpop.f32.mrb[43].mxu0  ;;  %2254 = vmatmul.mubr.msk.bf16.gmra.mrb[36].mxu1 %vm1309_vm3, %v826_v44 }
 0x13a   : > { %1606 = vmatprep.mubr.bf16.mxu1 %v2596_v3  ;;  %v1675_v51 = vld [vmem:[%s3498_s5] sm:$0x3] }
 0x13b   : > { %v781_v52 = vmax.f32 %v715_v50, 0.0 }
 0x13d   : > { %v831_v53 = vpack.c.bf16 %v781_v52, %v776_v49  ;;  %v3172_v49 = vrot.slane %v922_v43, %v2988_v27 }
 0x13e   : > { %v719_v54 = vpop.f32.mrb[44].mxu0 }
 0x13f   : > { %v720_v55 = vadd.f32 %v719_v54, %v3095_v7  ;;  %v2293_v56 = vpop.f32.mrb[45].mxu0 }
 0x140   : > { %v722_v57 = vpop.f32.mrb[46].mxu0 }
 0x141   : > { %v786_v58 = vmax.f32 %v720_v55, 0.0  ;;  %v723_v59 = vadd.f32 %v722_v57, %v3095_v7  ;;  %v2294_v60 = vpop.f32.mrb[47].mxu0  ;;  %2255 = vmatmul.mubr.msk.bf16.gmra.mrb[40].mxu1 %vm1309_vm3, %v831_v53 }
 0x142   : > { %1616 = vmatprep.mubr.bf16.mxu1 %v2596_v3  ;;  %v3182_v60 = vrot.slane %v1675_v51, %v2988_v27 }
 0x143   : > { %v791_v61 = vmax.f32 %v723_v59, 0.0 }
 0x145   : > { %v836_v62 = vpack.c.bf16 %v791_v61, %v786_v58 }
 0x146   : > { %v727_v63 = vpop.f32.mrb[48].mxu0 }
 0x147   : > { %v728_v0 = vadd.f32 %v727_v63, %v3095_v7  ;;  %v2297_v1 = vpop.f32.mrb[49].mxu0  ;;  %v3185_v63 = vrot.slane %v1675_v51, %v2979_v24 }
 0x148   : > { %v730_v23 = vpop.f32.mrb[50].mxu0 }
 0x149   : > { %v796_v2 = vmax.f32 %v728_v0, 0.0  ;;  %v731_v4 = vadd.f32 %v730_v23, %v3095_v7  ;;  %v2298_v5 = vpop.f32.mrb[51].mxu0  ;;  %2256 = vmatmul.mubr.msk.bf16.gmra.mrb[44].mxu1 %vm1309_vm3, %v836_v62 }
 0x14a   : > { %1626 = vmatprep.mubr.bf16.mxu1 %v2596_v3 }
 0x14b   : > { %v801_v6 = vmax.f32 %v731_v4, 0.0 }
 0x14d   : > { %v841_v8 = vpack.c.bf16 %v801_v6, %v796_v2 }
 0x14e   : > { %v735_v9 = vpop.f32.mrb[52].mxu0 }
 0x14f   : > { %v736_v29 = vadd.f32 %v735_v9, %v3095_v7  ;;  %v2301_v10 = vpop.f32.mrb[53].mxu0 }
 0x150   : > { %v738_v30 = vpop.f32.mrb[54].mxu0 }
 0x151   : > { %v806_v11 = vmax.f32 %v736_v29, 0.0  ;;  %v739_v13 = vadd.f32 %v738_v30, %v3095_v7  ;;  %v2302_v14 = vpop.f32.mrb[55].mxu0  ;;  %2257 = vmatmul.mubr.msk.bf16.gmra.mrb[48].mxu1 %vm1309_vm3, %v841_v8 }
 0x152   : > { %1636 = vmatprep.mubr.bf16.mxu1 %v2596_v3 }
 0x153   : > { %v811_v15 = vmax.f32 %v739_v13, 0.0 }
 0x155   : > { %v846_v12 = vpack.c.bf16 %v811_v15, %v806_v11 }
 0x159   : > { %2258 = vmatmul.mubr.msk.bf16.gmra.mrb[52].mxu1 %vm1309_vm3, %v846_v12 }
 0x1c4   : > { %v1372_v31 = vpop.f32.mrb[56].mxu0 }
 0x1c5   : > { %v1374_v32 = vpop.f32.mrb[57].mxu0  ;;  %v1373_v50 = vadd.f32 %v1372_v31, %v3167_v47 }
 0x1c6   : > { %v1376_v16 = vpop.f32.mrb[58].mxu0  ;;  %v1375_v52 = vadd.f32 %v1374_v32, %v3172_v49 }
 0x1c7   : > { %v1378_v17 = vpop.f32.mrb[59].mxu0  ;;  %v1377_v54 = vadd.f32 %v1376_v16, %v3167_v47 }
 0x1c8   : > { %v1379_v57 = vadd.f32 %v1378_v17, %v3172_v49 }
 0x1cc   : > { %v1382_v26 = vpop.f32.mrb[60].mxu0 }
 0x1cd   : > { %v1384_v18 = vpop.f32.mrb[61].mxu0  ;;  %v1383_v6 = vadd.f32 %v1382_v26, %v3167_v47 }
 0x1ce   : > { %v1386_v19 = vpop.f32.mrb[62].mxu0  ;;  %v1385_v27 = vadd.f32 %v1384_v18, %v3172_v49 }
 0x1cf   : > { %v1388_v20 = vpop.f32.mrb[63].mxu0  ;;  %v1387_v10 = vadd.f32 %v1386_v19, %v3167_v47 }
 0x1d0   : > { %v1389_v15 = vadd.f32 %v1388_v20, %v3172_v49 }
 0x1d4   : > { %v3125_v21 = vpop.f32.mrb[64].mxu0 }
 0x1d5   : > { %v3127_v7 = vpop.f32.mrb[65].mxu0 }
 0x1d6   : > { %v3129_v22 = vpop.f32.mrb[66].mxu0 }
 0x1d7   : > { %v3131_v25 = vpop.f32.mrb[67].mxu0 }
 0x1dc   : > { %v3133_v3 = vpop.f32.mrb[68].mxu0 }
 0x1dd   : > { %v3135_v28 = vpop.f32.mrb[69].mxu0 }
 0x1de   : > { %v3137_v33 = vpop.f32.mrb[70].mxu0 }
 0x1df   : > { %v3139_v34 = vpop.f32.mrb[71].mxu0 }
 0x1e4   : > { %v3141_v35 = vpop.f32.mrb[72].mxu0 }
 0x1e5   : > { %v3143_v36 = vpop.f32.mrb[73].mxu0 }
 0x1e6   : > { %v3145_v37 = vpop.f32.mrb[74].mxu0 }
 0x1e7   : > { %v3147_v38 = vpop.f32.mrb[75].mxu0 }
 0x1ec   : > { %v3149_v39 = vpop.f32.mrb[76].mxu0 }
 0x1ed   : > { %v3151_v40 = vpop.f32.mrb[77].mxu0 }
 0x1ee   : > { %v3153_v41 = vpop.f32.mrb[78].mxu0 }
 0x1ef   : > { %v3155_v42 = vpop.f32.mrb[79].mxu0 }
 0x1f4   : > { %v3160_v44 = vpop.f32.mrb[80].mxu0 }
 0x1f5   : > { %v3162_v45 = vpop.f32.mrb[81].mxu0 }
 0x1f6   : > { %v3164_v46 = vpop.f32.mrb[82].mxu0 }
 0x1f7   : > { %v3169_v48 = vpop.f32.mrb[83].mxu0 }
 0x1fc   : > { %v1578_v53 = vpop.f32.mrb[28].mxu1 }
 0x1fd   : > { %v2304_v55 = vadd.f32 %v1578_v53, %v1373_v50  ;;  %v1580_v56 = vpop.f32.mrb[29].mxu1  ;;  %v1393_v53 = vadd.f32 %v3125_v21, %v3167_v47  ;;  %v1399_v21 = vadd.f32 %v3131_v25, %v3172_v49 }
 0x1fe   : > { %v2306_v58 = vadd.f32 %v1580_v56, %v1375_v52  ;;  %v1582_v59 = vpop.f32.mrb[30].mxu1 }
 0x1ff   : > { %v1647_v61 = vmax.f32 %v2304_v55, 0.0  ;;  %v2308_v62 = vadd.f32 %v1582_v59, %v1377_v54  ;;  %v1584_v0 = vpop.f32.mrb[31].mxu1  ;;  %v1395_v54 = vadd.f32 %v3127_v7, %v3172_v49 }
 0x200   : > { %v1648_v1 = vmax.f32 %v2306_v58, 0.0  ;;  %v2310_v23 = vadd.f32 %v1584_v0, %v1379_v57  ;;  %v1397_v58 = vadd.f32 %v3129_v22, %v3167_v47 }
 0x201   : > { %v1649_v2 = vmax.f32 %v2308_v62, 0.0  ;;  %v1687_v8 = vmul.f32 %v3185_v63, %v1647_v61 }
 0x202   : > { %v1650_v4 = vmax.f32 %v2310_v23, 0.0  ;;  %v1688_v5 = vmul.f32 %v3182_v60, %v1648_v1 }
 0x203   : > { %v1689_v30 = vmul.f32 %v3185_v63, %v1649_v2 }
 0x204   : > { %v1690_v9 = vmul.f32 %v3182_v60, %v1650_v4  ;;  %v1588_v29 = vpop.f32.mrb[32].mxu1  ;;  %v1716_v24 = vsel %vm1715_vm4, %v1688_v5, 0.0 }
 0x205   : > { %v2312_v11 = vadd.f32 %v1588_v29, %v1383_v6  ;;  %v1590_v13 = vpop.f32.mrb[33].mxu1  ;;  %v1717_v14 = vadd.f32 %v1716_v24, %v1687_v8  ;;  %v1403_v24 = vadd.f32 %v3133_v3, %v3167_v47  ;;  %v1409_v3 = vadd.f32 %v3139_v34, %v3172_v49 }
 0x206   : > { %v2314_v12 = vadd.f32 %v1590_v13, %v1385_v27  ;;  %v1592_v31 = vpop.f32.mrb[34].mxu1  ;;  %v1720_v32 = vsel %vm1715_vm4, %v1690_v9, 0.0 }
 0x207   : > { %v1651_v16 = vmax.f32 %v2312_v11, 0.0  ;;  %v2316_v17 = vadd.f32 %v1592_v31, %v1387_v10  ;;  %v1594_v26 = vpop.f32.mrb[35].mxu1  ;;  %1718 = vadd.xlane.f32.xlu0 %v1717_v14  ;;  %v1721_v18 = vadd.f32 %v1720_v32, %v1689_v30  ;;  %v1405_v10 = vadd.f32 %v3135_v28, %v3172_v49 }
 0x208   : > { %v1652_v43 = vmax.f32 %v2314_v12, 0.0  ;;  %v2318_v50 = vadd.f32 %v1594_v26, %v1389_v15  ;;  %v1407_v14 = vadd.f32 %v3137_v33, %v3167_v47 }
 0x209   : > { %v1653_v51 = vmax.f32 %v2316_v17, 0.0  ;;  %v1691_v20 = vmul.f32 %v3185_v63, %v1651_v16 }
 0x20a   : > { %v1654_v19 = vmax.f32 %v2318_v50, 0.0  ;;  %v1692_v52 = vmul.f32 %v3182_v60, %v1652_v43 }
 0x20b   : > { %1722 = vadd.xlane.f32.xlu0 %v1721_v18  ;;  %v1693_v59 = vmul.f32 %v3185_v63, %v1653_v51 }
 0x20c   : > { %v1694_v55 = vmul.f32 %v3182_v60, %v1654_v19  ;;  %v1598_v56 = vpop.f32.mrb[36].mxu1  ;;  %v1724_v57 = vsel %vm1715_vm4, %v1692_v52, 0.0 }
 0x20d   : > { %v2320_v61 = vadd.f32 %v1598_v56, %v1393_v53  ;;  %v1600_v62 = vpop.f32.mrb[37].mxu1  ;;  %v1725_v0 = vadd.f32 %v1724_v57, %v1691_v20  ;;  %v1413_v20 = vadd.f32 %v3141_v35, %v3167_v47  ;;  %v1419_v35 = vadd.f32 %v3147_v38, %v3172_v49 }
 0x20e   : > { %v2322_v1 = vadd.f32 %v1600_v62, %v1395_v54  ;;  %v1602_v23 = vpop.f32.mrb[38].mxu1  ;;  %v1728_v7 = vsel %vm1715_vm4, %v1694_v55, 0.0  ;;  %v1415_v54 = vadd.f32 %v3143_v36, %v3172_v49 }
 0x20f   : > { %v1655_v2 = vmax.f32 %v2320_v61, 0.0  ;;  %v2324_v4 = vadd.f32 %v1602_v23, %v1397_v58  ;;  %v1604_v5 = vpop.f32.mrb[39].mxu1  ;;  %1726 = vadd.xlane.f32.xlu1 %v1725_v0  ;;  %v1729_v6 = vadd.f32 %v1728_v7, %v1693_v59  ;;  %v1417_v58 = vadd.f32 %v3145_v37, %v3167_v47 }
 0x210   : > { %v1656_v8 = vmax.f32 %v2322_v1, 0.0  ;;  %v2326_v27 = vadd.f32 %v1604_v5, %v1399_v21 }
 0x211   : > { %v1657_v22 = vmax.f32 %v2324_v4, 0.0  ;;  %v1695_v25 = vmul.f32 %v3185_v63, %v1655_v2 }
 0x212   : > { %v1696_v9 = vmul.f32 %v3182_v60, %v1656_v8  ;;  %v1658_v29 = vmax.f32 %v2326_v27, 0.0 }
 0x213   : > { %1730 = vadd.xlane.f32.xlu1 %v1729_v6  ;;  %v1697_v15 = vmul.f32 %v3185_v63, %v1657_v22  ;;  %v1423_v22 = vadd.f32 %v3149_v39, %v3167_v47  ;;  %v1429_v39 = vadd.f32 %v3155_v42, %v3172_v49 }
 0x214   : > { %v1698_v30 = vmul.f32 %v3182_v60, %v1658_v29  ;;  %v1608_v11 = vpop.f32.mrb[40].mxu1  ;;  %v1732_v13 = vsel %vm1715_vm4, %v1696_v9, 0.0  ;;  %v1425_v9 = vadd.f32 %v3151_v40, %v3172_v49 }
 0x215   : > { %v2328_v12 = vadd.f32 %v1608_v11, %v1403_v24  ;;  %v1610_v31 = vpop.f32.mrb[41].mxu1  ;;  %v1733_v32 = vadd.f32 %v1732_v13, %v1695_v25 }
 0x216   : > { %v2330_v16 = vadd.f32 %v1610_v31, %v1405_v10  ;;  %v1612_v17 = vpop.f32.mrb[42].mxu1  ;;  %v1736_v28 = vsel %vm1715_vm4, %v1698_v30, 0.0  ;;  %v1427_v10 = vadd.f32 %v3153_v41, %v3167_v47 }
 0x217   : > { %v1659_v26 = vmax.f32 %v2328_v12, 0.0  ;;  %v2332_v18 = vadd.f32 %v1612_v17, %v1407_v14  ;;  %v1614_v43 = vpop.f32.mrb[43].mxu1  ;;  %1734 = vadd.xlane.f32.xlu0 %v1733_v32  ;;  %v1737_v50 = vadd.f32 %v1736_v28, %v1697_v15 }
 0x218   : > { %v1660_v51 = vmax.f32 %v2330_v16, 0.0  ;;  %v2334_v19 = vadd.f32 %v1614_v43, %v1409_v3  ;;  %v1433_v43 = vadd.f32 %v3160_v44, %v3167_v47  ;;  %v1439_v44 = vadd.f32 %v3169_v48, %v3172_v49 }
 0x219   : > { %v1661_v33 = vmax.f32 %v2332_v18, 0.0  ;;  %1738 = vadd.xlane.f32.xlu1 %v1737_v50  ;;  %v1699_v34 = vmul.f32 %v3185_v63, %v1659_v26  ;;  %v1435_v50 = vadd.f32 %v3162_v45, %v3172_v49 }
 0x21a   : > { %v1700_v52 = vmul.f32 %v3182_v60, %v1660_v51  ;;  %v1662_v53 = vmax.f32 %v2334_v19, 0.0 }
 0x21b   : > { %v1701_v59 = vmul.f32 %v3185_v63, %v1661_v33 }
 0x21c   : > { %v1702_v55 = vmul.f32 %v3182_v60, %v1662_v53  ;;  %v1618_v56 = vpop.f32.mrb[44].mxu1  ;;  %v1740_v57 = vsel %vm1715_vm4, %v1700_v52, 0.0  ;;  %v1437_v52 = vadd.f32 %v3164_v46, %v3167_v47 }
 0x21d   : > { %v2336_v61 = vadd.f32 %v1618_v56, %v1413_v20  ;;  %v1620_v62 = vpop.f32.mrb[45].mxu1  ;;  %v1741_v0 = vadd.f32 %v1740_v57, %v1699_v34 }
 0x21e   : > { %v2338_v21 = vadd.f32 %v1620_v62, %v1415_v54  ;;  %v1622_v1 = vpop.f32.mrb[46].mxu1  ;;  %v1744_v36 = vsel %vm1715_vm4, %v1702_v55, 0.0 }
 0x21f   : > { %v1663_v23 = vmax.f32 %v2336_v61, 0.0  ;;  %v2340_v7 = vadd.f32 %v1622_v1, %v1417_v58  ;;  %v1624_v2 = vpop.f32.mrb[47].mxu1  ;;  %1742 = vadd.xlane.f32.xlu0 %v1741_v0  ;;  %v1745_v4 = vadd.f32 %v1744_v36, %v1701_v59 }
 0x220   : > { %v1664_v5 = vmax.f32 %v2338_v21, 0.0  ;;  %v2342_v6 = vadd.f32 %v1624_v2, %v1419_v35  ;;  %v3273_v2 = vld [vmem:[#allocation2] ss:$0 sm:$0xff] }
 0x221   : > { %v1665_v37 = vmax.f32 %v2340_v7, 0.0  ;;  %1746 = vadd.xlane.f32.xlu1 %v1745_v4  ;;  %v1703_v38 = vmul.f32 %v3185_v63, %v1663_v23 }
 0x222   : > { %v1704_v8 = vmul.f32 %v3182_v60, %v1664_v5  ;;  %v1666_v27 = vmax.f32 %v2342_v6, 0.0 }
 0x223   : > { %v1705_v30 = vmul.f32 %v3185_v63, %v1665_v37 }
 0x224   : > { %v1706_v29 = vmul.f32 %v3182_v60, %v1666_v27  ;;  %v1628_v24 = vpop.f32.mrb[48].mxu1  ;;  %v1748_v25 = vsel %vm1715_vm4, %v1704_v8, 0.0 }
 0x225   : > { %v2344_v11 = vadd.f32 %v1628_v24, %v1423_v22  ;;  %v1630_v13 = vpop.f32.mrb[49].mxu1  ;;  %v1749_v14 = vadd.f32 %v1748_v25, %v1703_v38 }
 0x226   : > { %v2346_v15 = vadd.f32 %v1630_v13, %v1425_v9  ;;  %v1632_v12 = vpop.f32.mrb[50].mxu1  ;;  %v1752_v40 = vsel %vm1715_vm4, %v1706_v29, 0.0 }
 0x227   : > { %v1667_v31 = vmax.f32 %v2344_v11, 0.0  ;;  %v2348_v32 = vadd.f32 %v1632_v12, %v1427_v10  ;;  %v1634_v3 = vpop.f32.mrb[51].mxu1  ;;  %1750 = vadd.xlane.f32.xlu0 %v1749_v14  ;;  %v1753_v16 = vadd.f32 %v1752_v40, %v1705_v30 }
 0x228   : > { %v1668_v17 = vmax.f32 %v2346_v15, 0.0  ;;  %v2350_v28 = vadd.f32 %v1634_v3, %v1429_v39 }
 0x229   : > { %v1669_v41 = vmax.f32 %v2348_v32, 0.0  ;;  %1754 = vadd.xlane.f32.xlu1 %v1753_v16  ;;  %v1707_v42 = vmul.f32 %v3185_v63, %v1667_v31 }
 0x22a   : > { %v1708_v26 = vmul.f32 %v3182_v60, %v1668_v17  ;;  %v1670_v18 = vmax.f32 %v2350_v28, 0.0 }
 0x22b   : > { %v1709_v53 = vmul.f32 %v3185_v63, %v1669_v41 }
 0x22c   : > { %v1710_v51 = vmul.f32 %v3182_v60, %v1670_v18  ;;  %v1638_v19 = vpop.f32.mrb[52].mxu1  ;;  %v1756_v33 = vsel %vm1715_vm4, %v1708_v26, 0.0 }
 0x22d   : > { %v2352_v20 = vadd.f32 %v1638_v19, %v1433_v43  ;;  %v1640_v34 = vpop.f32.mrb[53].mxu1  ;;  %v1757_v54 = vadd.f32 %v1756_v33, %v1707_v42 }
 0x22e   : > { %v2354_v55 = vadd.f32 %v1640_v34, %v1435_v50  ;;  %v1642_v56 = vpop.f32.mrb[54].mxu1  ;;  %v1760_v45 = vsel %vm1715_vm4, %v1710_v51, 0.0 }
 0x22f   : > { %v1671_v57 = vmax.f32 %v2352_v20, 0.0  ;;  %v2356_v58 = vadd.f32 %v1642_v56, %v1437_v52  ;;  %v1644_v59 = vpop.f32.mrb[55].mxu1  ;;  %1758 = vadd.xlane.f32.xlu0 %v1757_v54  ;;  %v1761_v61 = vadd.f32 %v1760_v45, %v1709_v53 }
 0x230   : > { %v1672_v62 = vmax.f32 %v2354_v55, 0.0  ;;  %v2358_v0 = vadd.f32 %v1644_v59, %v1439_v44 }
 0x231   : > { %v1673_v46 = vmax.f32 %v2356_v58, 0.0  ;;  %1762 = vadd.xlane.f32.xlu1 %v1761_v61  ;;  %v1711_v21 = vmul.f32 %v3185_v63, %v1671_v57 }
 0x232   : > { %v1712_v47 = vmul.f32 %v3182_v60, %v1672_v62  ;;  %v1674_v35 = vmax.f32 %v2358_v0, 0.0 }
 0x233   : > { %v1713_v1 = vmul.f32 %v3185_v63, %v1673_v46 }
 0x234   : > { %v1714_v48 = vmul.f32 %v3182_v60, %v1674_v35  ;;  %v1764_v49 = vsel %vm1715_vm4, %v1712_v47, 0.0 }
 0x235   : > { %v1765_v36 = vadd.f32 %v1764_v49, %v1711_v21 }
 0x236   : > { %v1768_v23 = vsel %vm1715_vm4, %v1714_v48, 0.0 }
 0x237   : > { %1766 = vadd.xlane.f32.xlu0 %v1765_v36  ;;  %v1769_v7 = vadd.f32 %v1768_v23, %v1713_v1 }
 0x239   : > { %1770 = vadd.xlane.f32.xlu1 %v1769_v7 }
 0x294   : > { %v1719_v4 = vpop.xlane.xlu0 %1718 }
 0x295   : > { %v1772_v5 = vmul.f32 0.5, %v1719_v4 }
 0x297   : > { %v3276_v6 = vadd.f32 %v3273_v2, %v1772_v5 }
 0x298   : > { %v1723_v37 = vpop.xlane.xlu0 %1722 }
 0x299   : > { %v1849_v60 = vand.u32 2147483647, %v3276_v6  ;;  %v1773_v8 = vmul.f32 0.5, %v1723_v37  ;;  %v1807_v46 = vmax.f32 %v3276_v6, 0.0  ;;  %vm1821_vm6 = vcmp.ne.f32.partialorder %v3276_v6, %v3276_v6 }
 0x29b   : > { %v1863_v27 = vsub.f32 0.0, %v1849_v60  ;;  %v3280_v63 = vadd.f32 %v3273_v2, %v1773_v8 }
 0x29c   : > { %v1727_v22 = vpop.xlane.xlu1 %1726 }
 0x29d   : > { %v1877_v38 = vmul.f32 1.442695, %v1863_v27  ;;  %v1850_v9 = vand.u32 2147483647, %v3280_v63  ;;  %v1774_v29 = vmul.f32 0.5, %v1727_v22  ;;  %v1808_v49 = vmax.f32 %v3280_v63, 0.0 }
 0x29e   : > { %vm1822_vm8 = vcmp.ne.f32.partialorder %v3280_v63, %v3280_v63 }
 0x29f   : > { %2532 = vpow2.f32 %v1877_v38  ;;  %v1864_v24 = vsub.f32 0.0, %v1850_v9  ;;  %v3284_v25 = vadd.f32 %v3273_v2, %v1774_v29 }
 0x2a0   : > { %v1731_v10 = vpop.xlane.xlu1 %1730 }
 0x2a1   : > { %v1879_v30 = vmul.f32 1.442695, %v1864_v24  ;;  %v1775_v11 = vmul.f32 0.5, %v1731_v10  ;;  %v1851_v13 = vand.u32 2147483647, %v3284_v25  ;;  %vm1823_vm10 = vcmp.ne.f32.partialorder %v3284_v25, %v3284_v25 }
 0x2a3   : > { %2534 = vpow2.f32 %v1879_v30  ;;  %v3288_v14 = vadd.f32 %v3273_v2, %v1775_v11  ;;  %v1865_v39 = vsub.f32 0.0, %v1851_v13 }
 0x2a4   : > { %v1735_v15 = vpop.xlane.xlu0 %1734 }
 0x2a5   : > { %v1852_v12 = vand.u32 2147483647, %v3288_v14  ;;  %v1776_v40 = vmul.f32 0.5, %v1735_v15  ;;  %v1881_v31 = vmul.f32 1.442695, %v1865_v39  ;;  %v1809_v15 = vmax.f32 %v3284_v25, 0.0 }
 0x2a6   : > { %v1739_v32 = vpop.xlane.xlu1 %1738  ;;  %vm1824_vm12 = vcmp.ne.f32.partialorder %v3288_v14, %v3288_v14 }
 0x2a7   : > { %v1866_v3 = vsub.f32 0.0, %v1852_v12  ;;  %v3292_v16 = vadd.f32 %v3273_v2, %v1776_v40  ;;  %v1777_v17 = vmul.f32 0.5, %v1739_v32  ;;  %2536 = vpow2.f32 %v1881_v31 }
 0x2a9   : > { %v2533_v28 = vpop.eup %2532  ;;  %v1883_v41 = vmul.f32 1.442695, %v1866_v3  ;;  %v1853_v26 = vand.u32 2147483647, %v3292_v16  ;;  %v3296_v43 = vadd.f32 %v3273_v2, %v1777_v17  ;;  %vm1825_vm15 = vcmp.ne.f32.partialorder %v3292_v16, %v3292_v16 }
 0x2aa   : > { %v1905_v18 = vadd.f32 1.0, %v2533_v28  ;;  %v1908_v53 = vmul.f32 -0.5, %v2533_v28  ;;  %v1911_v59 = vand.u32 2147483647, %v2533_v28 }
 0x2ab   : > { %2538 = vpow2.f32 %v1883_v41  ;;  %v1867_v42 = vsub.f32 0.0, %v1853_v26  ;;  %v1854_v33 = vand.u32 2147483647, %v3296_v43  ;;  %vm1826_vm1 = vcmp.ne.f32.partialorder %v3296_v43, %v3296_v43 }
 0x2ac   : > { %2540 = vlog2.f32 %v1905_v18  ;;  %v1743_v50 = vpop.xlane.xlu0 %1742  ;;  %v1909_v58 = vadd.f32 1.0, %v1908_v53  ;;  %vm3320_vm7 = vcmp.lt.f32.partialorder %v1911_v59, 0.0004427343  ;;  %v1810_v53 = vmax.f32 %v3288_v14, 0.0 }
 0x2ad   : > { %v3298_v51 = vpop.eup %2534  ;;  %v1885_v19 = vmul.f32 1.442695, %v1867_v42  ;;  %v1778_v52 = vmul.f32 0.5, %v1743_v50  ;;  %v1868_v54 = vsub.f32 0.0, %v1854_v33 }
 0x2ae   : > { %v1914_v20 = vadd.f32 1.0, %v3298_v51  ;;  %v1747_v34 = vpop.xlane.xlu1 %1746  ;;  %v1917_v62 = vmul.f32 -0.5, %v3298_v51  ;;  %v1910_v23 = vmul.f32 %v2533_v28, %v1909_v58  ;;  %v1920_v38 = vand.u32 2147483647, %v3298_v51 }
 0x2af   : > { %2542 = vpow2.f32 %v1885_v19  ;;  %v3303_v44 = vadd.f32 %v3273_v2, %v1778_v52  ;;  %v1779_v55 = vmul.f32 0.5, %v1747_v34  ;;  %v1887_v56 = vmul.f32 1.442695, %v1868_v54 }
 0x2b0   : > { %2544 = vlog2.f32 %v1914_v20  ;;  %v1918_v8 = vadd.f32 1.0, %v1917_v62  ;;  %vm1921_vm9 = vcmp.lt.f32.partialorder %v1920_v38, 0.0004427343 }
 0x2b1   : > { %v1855_v45 = vand.u32 2147483647, %v3303_v44  ;;  %v3306_v57 = vpop.eup %2536  ;;  %v3309_v61 = vadd.f32 %v3273_v2, %v1779_v55  ;;  %2546 = vpow2.f32 %v1887_v56  ;;  %vm1827_vm2 = vcmp.ne.f32.partialorder %v3303_v44, %v3303_v44 }
 0x2b2   : > { %v1923_v0 = vadd.f32 1.0, %v3306_v57  ;;  %v1926_v27 = vmul.f32 -0.5, %v3306_v57  ;;  %v1919_v31 = vmul.f32 %v3298_v51, %v1918_v8  ;;  %v1929_v26 = vand.u32 2147483647, %v3306_v57 }
 0x2b3   : > { %v1869_v47 = vsub.f32 0.0, %v1855_v45  ;;  %v1856_v35 = vand.u32 2147483647, %v3309_v61 }
 0x2b4   : > { %v1751_v21 = vpop.xlane.xlu0 %1750  ;;  %2548 = vlog2.f32 %v1923_v0  ;;  %v1927_v32 = vadd.f32 1.0, %v1926_v27  ;;  %vm1930_vm11 = vcmp.lt.f32.partialorder %v1929_v26, 0.0004427343 }
 0x2b5   : > { %v3315_v48 = vpop.eup %2538  ;;  %v1780_v1 = vmul.f32 0.5, %v1751_v21  ;;  %v1889_v5 = vmul.f32 1.442695, %v1869_v47  ;;  %v1870_v22 = vsub.f32 0.0, %v1856_v35 }
 0x2b6   : > { %v2541_v36 = vpop.eup %2540  ;;  %v1932_v4 = vadd.f32 1.0, %v3315_v48  ;;  %v1755_v37 = vpop.xlane.xlu1 %1754  ;;  %v1935_v9 = vmul.f32 -0.5, %v3315_v48  ;;  %v1928_v52 = vmul.f32 %v3306_v57, %v1927_v32  ;;  %v1938_v20 = vand.u32 2147483647, %v3315_v48 }
 0x2b7   : > { %v1907_v60 = vmul.f32 0.6931472, %v2541_v36  ;;  %v3330_v29 = vadd.f32 %v3273_v2, %v1780_v1  ;;  %v1891_v30 = vmul.f32 1.442695, %v1870_v22  ;;  %v1781_v11 = vmul.f32 0.5, %v1755_v37 }
 0x2b8   : > { %2550 = vlog2.f32 %v1932_v4  ;;  %v1936_v18 = vadd.f32 1.0, %v1935_v9  ;;  %vm1939_vm13 = vcmp.lt.f32.partialorder %v1938_v20, 0.0004427343 }
 0x2b9   : > { %v3332_v24 = vpop.eup %2542  ;;  %v1913_v10 = vsel %vm3320_vm7, %v1910_v23, %v1907_v60  ;;  %2552 = vpow2.f32 %v1889_v5  ;;  %v1857_v17 = vand.u32 2147483647, %v3330_v29  ;;  %v3357_v42 = vadd.f32 %v3273_v2, %v1781_v11 }
 0x2ba   : > { %v2545_v13 = vpop.eup %2544  ;;  %v2031_v39 = vadd.f32 %v1913_v10, %v1807_v46  ;;  %v1941_v12 = vadd.f32 1.0, %v3332_v24  ;;  %2554 = vpow2.f32 %v1891_v30  ;;  %v1937_v45 = vmul.f32 %v3315_v48, %v1936_v18 }
 0x2bb   : > { %v1916_v40 = vmul.f32 0.6931472, %v2545_v13  ;;  %v3351_v28 = vpop.eup %2546  ;;  %v1871_v34 = vsub.f32 0.0, %v1857_v17  ;;  %v1858_v57 = vand.u32 2147483647, %v3357_v42  ;;  %v1811_v5 = vmax.f32 %v3292_v16, 0.0 }
 0x2bc   : > { %v2045_v3 = vsel %vm1821_vm6, %v3276_v6, %v2031_v39  ;;  %2556 = vlog2.f32 %v1941_v12  ;;  %v1759_v50 = vpop.xlane.xlu0 %1758  ;;  %v1944_v6 = vmul.f32 -0.5, %v3332_v24  ;;  %v1950_v19 = vadd.f32 1.0, %v3351_v28 }
 0x2bd   : > { %2060 = vst.msk [vmem:[%s3339_s13] sm:$0xff] %vm2059_vm5, %v2045_v3  ;;  %v1922_v41 = vsel %vm1921_vm9, %v1919_v31, %v1916_v40  ;;  %v1782_v56 = vmul.f32 0.5, %v1759_v50  ;;  %v1893_v58 = vmul.f32 1.442695, %v1871_v34  ;;  %v1947_v46 = vand.u32 2147483647, %v3332_v24 }
 0x2be   : > { %v2032_v51 = vadd.f32 %v1922_v41, %v1808_v49  ;;  %v2549_v33 = vpop.eup %2548  ;;  %2558 = vlog2.f32 %v1950_v19  ;;  %v1945_v0 = vadd.f32 1.0, %v1944_v6  ;;  %v1953_v47 = vmul.f32 -0.5, %v3351_v28  ;;  %v1763_v1 = vpop.xlane.xlu1 %1762 }
 0x2bf   : > { %v1925_v55 = vmul.f32 0.6931472, %v2549_v33  ;;  %2560 = vpow2.f32 %v1893_v58  ;;  %v1872_v49 = vsub.f32 0.0, %v1858_v57  ;;  %v3382_v36 = vadd.f32 %v3273_v2, %v1782_v56 }
 0x2c0   : > { %v2046_v54 = vsel %vm1822_vm8, %v3280_v63, %v2032_v51  ;;  %vm3393_vm14 = vcmp.lt.f32.partialorder %v1947_v46, 0.0004427343  ;;  %v1783_v22 = vmul.f32 0.5, %v1763_v1  ;;  %v1946_v9 = vmul.f32 %v3332_v24, %v1945_v0 }
 0x2c1   : > { %2061 = vst.msk [vmem:[%s3339_s13 + $0x8] sm:$0xff] %vm2059_vm5, %v2046_v54  ;;  %v1931_v62 = vsel %vm1930_vm11, %v1928_v52, %v1925_v55  ;;  %v1895_v37 = vmul.f32 1.442695, %v1872_v49  ;;  %v1954_v10 = vadd.f32 1.0, %v1953_v47  ;;  %v1956_v13 = vand.u32 2147483647, %v3351_v28 }
 0x2c2   : > { %v2551_v59 = vpop.eup %2550  ;;  %v2033_v63 = vadd.f32 %v1931_v62, %v1809_v15  ;;  %v1859_v39 = vand.u32 2147483647, %v3382_v36  ;;  %v3413_v32 = vadd.f32 %v3273_v2, %v1783_v22  ;;  %v1812_v51 = vmax.f32 %v3296_v43, 0.0 }
 0x2c3   : > { %v3376_v35 = vpop.eup %2552  ;;  %v1934_v21 = vmul.f32 0.6931472, %v2551_v59  ;;  %v1955_v41 = vmul.f32 %v3351_v28, %v1954_v10  ;;  %vm1957_vm0 = vcmp.lt.f32.partialorder %v1956_v13, 0.0004427343  ;;  %v1813_v47 = vmax.f32 %v3303_v44, 0.0 }
 0x2c4   : > { %v1959_v48 = vadd.f32 1.0, %v3376_v35  ;;  %v3384_v23 = vpop.eup %2554  ;;  %v2047_v7 = vsel %vm1823_vm10, %v3284_v25, %v2033_v63  ;;  %v1767_v30 = vpop.xlane.xlu0 %1766  ;;  %v1962_v12 = vmul.f32 -0.5, %v3376_v35  ;;  %v1873_v31 = vsub.f32 0.0, %v1859_v39 }
 0x2c5   : > { %v1940_v4 = vsel %vm1939_vm13, %v1937_v45, %v1934_v21  ;;  %2062 = vst.msk [vmem:[%s3339_s13 + $0x10] sm:$0xff] %vm2059_vm5, %v2047_v7  ;;  %v1968_v25 = vadd.f32 1.0, %v3384_v23  ;;  %v1784_v3 = vmul.f32 0.5, %v1767_v30  ;;  %v1971_v26 = vmul.f32 -0.5, %v3384_v23 }
 0x2c6   : > { %v2557_v60 = vpop.eup %2556  ;;  %v2034_v8 = vadd.f32 %v1940_v4, %v1810_v53  ;;  %2562 = vlog2.f32 %v1959_v48  ;;  %v1771_v15 = vpop.xlane.xlu1 %1770  ;;  %v1897_v6 = vmul.f32 1.442695, %v1873_v31  ;;  %v1963_v52 = vadd.f32 1.0, %v1962_v12 }
 0x2c7   : > { %v1943_v38 = vmul.f32 0.6931472, %v2557_v60  ;;  %2564 = vpow2.f32 %v1895_v37  ;;  %v1785_v18 = vmul.f32 0.5, %v1771_v15  ;;  %v1860_v53 = vand.u32 2147483647, %v3413_v32 }
 0x2c8   : > { %v2048_v11 = vsel %vm1824_vm12, %v3288_v14, %v2034_v8  ;;  %2566 = vlog2.f32 %v1968_v25  ;;  %v2559_v40 = vpop.eup %2558  ;;  %v3423_v20 = vadd.f32 %v3273_v2, %v1784_v3  ;;  %v1965_v34 = vand.u32 2147483647, %v3376_v35 }
 0x2c9   : > { %2063 = vst.msk [vmem:[%s3339_s13 + $0x18] sm:$0xff] %vm2059_vm5, %v2048_v11  ;;  %v1949_v24 = vsel %vm3393_vm14, %v1946_v9, %v1943_v38  ;;  %v1952_v17 = vmul.f32 0.6931472, %v2559_v40  ;;  %v2561_v19 = vpop.eup %2560  ;;  %v1972_v55 = vadd.f32 1.0, %v1971_v26  ;;  %2568 = vpow2.f32 %v1897_v6 }
 0x2ca   : > { %v2035_v14 = vadd.f32 %v1949_v24, %v1811_v5  ;;  %v1977_v54 = vadd.f32 1.0, %v2561_v19  ;;  %v1874_v56 = vsub.f32 0.0, %v1860_v53  ;;  %v1974_v57 = vand.u32 2147483647, %v3384_v23 }
 0x2cb   : > { %v1958_v33 = vsel %vm1957_vm0, %v1955_v41, %v1952_v17  ;;  %v1964_v62 = vmul.f32 %v3376_v35, %v1963_v52  ;;  %vm1966_vm3 = vcmp.lt.f32.partialorder %v1965_v34, 0.0004427343  ;;  %v1973_v49 = vmul.f32 %v3384_v23, %v1972_v55 }
 0x2cc   : > { %v2049_v50 = vsel %vm1825_vm15, %v3292_v16, %v2035_v14  ;;  %v2036_v28 = vadd.f32 %v1958_v33, %v1812_v51  ;;  %v3427_v16 = vadd.f32 %v3273_v2, %v1785_v18  ;;  %2570 = vlog2.f32 %v1977_v54 }
 0x2cd   : > { %2064 = vst.msk [vmem:[%s3339_s13 + $0x20] sm:$0xff] %vm2059_vm5, %v2049_v50  ;;  %v1899_v0 = vmul.f32 1.442695, %v1874_v56  ;;  %v1861_v2 = vand.u32 2147483647, %v3423_v20  ;;  %v1980_v1 = vmul.f32 -0.5, %v2561_v19  ;;  %vm1828_vm6 = vcmp.ne.f32.partialorder %v3309_v61, %v3309_v61 }
 0x2ce   : > { %v2050_v58 = vsel %vm1826_vm1, %v3296_v43, %v2036_v28  ;;  %v1862_v43 = vand.u32 2147483647, %v3427_v16  ;;  %v1814_v5 = vmax.f32 %v3309_v61, 0.0  ;;  %vm1975_vm4 = vcmp.lt.f32.partialorder %v1974_v57, 0.0004427343 }
 0x2cf   : > { %2065 = vst.msk [vmem:[%s3339_s13 + $0x28] sm:$0xff] %vm2059_vm5, %v2050_v58  ;;  %2572 = vpow2.f32 %v1899_v0  ;;  %v1875_v4 = vsub.f32 0.0, %v1861_v2  ;;  %v1981_v22 = vadd.f32 1.0, %v1980_v1  ;;  %v1983_v9 = vand.u32 2147483647, %v2561_v19 }
 0x2d0   : > { %v2563_v45 = vpop.eup %2562  ;;  %v1876_v37 = vsub.f32 0.0, %v1862_v43  ;;  %v1815_v15 = vmax.f32 %v3330_v29, 0.0  ;;  %vm1829_vm8 = vcmp.ne.f32.partialorder %v3330_v29, %v3330_v29  ;;  %v1816_v50 = vmax.f32 %v3357_v42, 0.0 }
 0x2d1   : > { %v1961_v59 = vmul.f32 0.6931472, %v2563_v45  ;;  %v2565_v46 = vpop.eup %2564  ;;  %v1901_v27 = vmul.f32 1.442695, %v1875_v4  ;;  %v1982_v39 = vmul.f32 %v2561_v19, %v1981_v22  ;;  %vm1984_vm7 = vcmp.lt.f32.partialorder %v1983_v9, 0.0004427343 }
 0x2d2   : > { %v2567_v63 = vpop.eup %2566  ;;  %v1986_v48 = vadd.f32 1.0, %v2565_v46  ;;  %v1903_v38 = vmul.f32 1.442695, %v1876_v37  ;;  %v1989_v10 = vmul.f32 -0.5, %v2565_v46  ;;  %v1992_v40 = vand.u32 2147483647, %v2565_v46 }
 0x2d3   : > { %v1967_v21 = vsel %vm1966_vm3, %v1964_v62, %v1961_v59  ;;  %v1970_v7 = vmul.f32 0.6931472, %v2567_v63  ;;  %v2569_v25 = vpop.eup %2568  ;;  %vm1830_vm10 = vcmp.ne.f32.partialorder %v3357_v42, %v3357_v42  ;;  %v1817_v58 = vmax.f32 %v3382_v36, 0.0 }
 0x2d4   : > { %v2037_v35 = vadd.f32 %v1967_v21, %v1813_v47  ;;  %2574 = vlog2.f32 %v1986_v48  ;;  %v1990_v24 = vadd.f32 1.0, %v1989_v10  ;;  %vm1993_vm9 = vcmp.lt.f32.partialorder %v1992_v40, 0.0004427343 }
 0x2d5   : > { %v1976_v8 = vsel %vm1975_vm4, %v1973_v49, %v1970_v7  ;;  %2576 = vpow2.f32 %v1901_v27  ;;  %v2001_v28 = vand.u32 2147483647, %v2569_v25  ;;  %vm1831_vm12 = vcmp.ne.f32.partialorder %v3382_v36, %v3382_v36 }
 0x2d6   : > { %v2051_v60 = vsel %vm1827_vm2, %v3303_v44, %v2037_v35  ;;  %v2038_v23 = vadd.f32 %v1976_v8, %v1814_v5  ;;  %2578 = vpow2.f32 %v1903_v38  ;;  %v2571_v11 = vpop.eup %2570  ;;  %v1995_v44 = vadd.f32 1.0, %v2569_v25 }
 0x2d7   : > { %2066 = vst.msk [vmem:[%s3339_s13 + $0x30] sm:$0xff] %vm2059_vm5, %v2051_v60  ;;  %v1979_v13 = vmul.f32 0.6931472, %v2571_v11  ;;  %v1991_v18 = vmul.f32 %v2565_v46, %v1990_v24  ;;  %vm2002_vm11 = vcmp.lt.f32.partialorder %v2001_v28, 0.0004427343  ;;  %v1818_v49 = vmax.f32 %v3413_v32, 0.0 }
 0x2d8   : > { %v2052_v30 = vsel %vm1828_vm6, %v3309_v61, %v2038_v23  ;;  %2580 = vlog2.f32 %v1995_v44  ;;  %v1998_v61 = vmul.f32 -0.5, %v2569_v25  ;;  %vm1832_vm14 = vcmp.ne.f32.partialorder %v3413_v32, %v3413_v32 }
 0x2d9   : > { %2067 = vst.msk [vmem:[%s3339_s13 + $0x38] sm:$0xff] %vm2059_vm5, %v2052_v30  ;;  %v1985_v12 = vsel %vm1984_vm7, %v1982_v39, %v1979_v13  ;;  %v2573_v14 = vpop.eup %2572  ;;  %v1820_v9 = vmax.f32 %v3427_v16, 0.0  ;;  %vm1833_vm1 = vcmp.ne.f32.partialorder %v3423_v20, %v3423_v20  ;;  %vm1834_vm2 = vcmp.ne.f32.partialorder %v3427_v16, %v3427_v16 }
 0x2da   : > { %v2039_v31 = vadd.f32 %v1985_v12, %v1815_v15  ;;  %v2004_v17 = vadd.f32 1.0, %v2573_v14  ;;  %v1999_v52 = vadd.f32 1.0, %v1998_v61  ;;  %v2010_v0 = vand.u32 2147483647, %v2573_v14 }
 0x2dc   : > { %v2053_v41 = vsel %vm1829_vm8, %v3330_v29, %v2039_v31  ;;  %2582 = vlog2.f32 %v2004_v17  ;;  %v2007_v29 = vmul.f32 -0.5, %v2573_v14  ;;  %v2000_v45 = vmul.f32 %v2569_v25, %v1999_v52 }
 0x2dd   : > { %2068 = vst.msk [vmem:[%s3339_s13 + $0x40] sm:$0xff] %vm2059_vm5, %v2053_v41  ;;  %vm2011_vm13 = vcmp.lt.f32.partialorder %v2010_v0, 0.0004427343 }
 0x2de   : > { %v2575_v3 = vpop.eup %2574  ;;  %v2008_v57 = vadd.f32 1.0, %v2007_v29 }
 0x2df   : > { %v1988_v26 = vmul.f32 0.6931472, %v2575_v3  ;;  %v2577_v51 = vpop.eup %2576 }
 0x2e0   : > { %v2579_v19 = vpop.eup %2578  ;;  %v2013_v53 = vadd.f32 1.0, %v2577_v51  ;;  %v2016_v59 = vmul.f32 -0.5, %v2577_v51  ;;  %v2009_v63 = vmul.f32 %v2573_v14, %v2008_v57  ;;  %v2019_v1 = vand.u32 2147483647, %v2577_v51 }
 0x2e1   : > { %v1994_v6 = vsel %vm1993_vm9, %v1991_v18, %v1988_v26  ;;  %v2022_v34 = vadd.f32 1.0, %v2579_v19  ;;  %v2025_v2 = vmul.f32 -0.5, %v2579_v19  ;;  %v2028_v7 = vand.u32 2147483647, %v2579_v19 }
 0x2e2   : > { %v2040_v33 = vadd.f32 %v1994_v6, %v1816_v50  ;;  %2584 = vlog2.f32 %v2013_v53  ;;  %v2581_v55 = vpop.eup %2580  ;;  %v2017_v21 = vadd.f32 1.0, %v2016_v59  ;;  %vm2020_vm15 = vcmp.lt.f32.partialorder %v2019_v1, 0.0004427343 }
 0x2e3   : > { %2586 = vlog2.f32 %v2022_v34  ;;  %v1997_v56 = vmul.f32 0.6931472, %v2581_v55  ;;  %v2026_v48 = vadd.f32 1.0, %v2025_v2  ;;  %vm2029_vm0 = vcmp.lt.f32.partialorder %v2028_v7, 0.0004427343 }
 0x2e4   : > { %v2054_v54 = vsel %vm1830_vm10, %v3357_v42, %v2040_v33  ;;  %v2018_v8 = vmul.f32 %v2577_v51, %v2017_v21 }
 0x2e5   : > { %2069 = vst.msk [vmem:[%s3339_s13 + $0x48] sm:$0xff] %vm2059_vm5, %v2054_v54  ;;  %v2003_v62 = vsel %vm2002_vm11, %v2000_v45, %v1997_v56  ;;  %v2027_v22 = vmul.f32 %v2579_v19, %v2026_v48 }
 0x2e6   : > { %v2041_v46 = vadd.f32 %v2003_v62, %v1817_v58  ;;  %v2583_v47 = vpop.eup %2582 }
 0x2e7   : > { %v2006_v43 = vmul.f32 0.6931472, %v2583_v47 }
 0x2e8   : > { %v2055_v42 = vsel %vm1831_vm12, %v3382_v36, %v2041_v46  ;;  %v1819_v36 = vmax.f32 %v3423_v20, 0.0 }
 0x2e9   : > { %2070 = vst.msk [vmem:[%s3339_s13 + $0x50] sm:$0xff] %vm2059_vm5, %v2055_v42  ;;  %v2012_v35 = vsel %vm2011_vm13, %v2009_v63, %v2006_v43 }
 0x2ea   : > { %v2042_v5 = vadd.f32 %v2012_v35, %v1818_v49 }
 0x2ec   : > { %v2585_v4 = vpop.eup %2584  ;;  %v2056_v27 = vsel %vm1832_vm14, %v3413_v32, %v2042_v5 }
 0x2ed   : > { %v2587_v37 = vpop.eup %2586  ;;  %v2015_v60 = vmul.f32 0.6931472, %v2585_v4  ;;  %2071 = vst.msk [vmem:[%s3339_s13 + $0x58] sm:$0xff] %vm2059_vm5, %v2056_v27 }
 0x2ee   : > { %v2024_v23 = vmul.f32 0.6931472, %v2587_v37 }
 0x2ef   : > { %v2021_v38 = vsel %vm2020_vm15, %v2018_v8, %v2015_v60 }
 0x2f0   : > { %v2043_v10 = vadd.f32 %v2021_v38, %v1819_v36  ;;  %v2030_v25 = vsel %vm2029_vm0, %v2027_v22, %v2024_v23 }
 0x2f1   : > { %v2044_v30 = vadd.f32 %v2030_v25, %v1820_v9 }
 0x2f2   : > { %v2057_v11 = vsel %vm1833_vm1, %v3423_v20, %v2043_v10 }
 0x2f3   : > { %2072 = vst.msk [vmem:[%s3339_s13 + $0x60] sm:$0xff] %vm2059_vm5, %v2057_v11  ;;  %v2058_v32 = vsel %vm1834_vm2, %v3427_v16, %v2044_v30 }
 0x2f4   : > { %2073 = vst.msk [vmem:[%s3339_s13 + $0x68] sm:$0xff] %vm2059_vm5, %v2058_v32 }
 0x2f5 PF: > { %s19_s26 = sadd.s32 1, %s2594_s26  }
 0x2f6   : > { %p16_p4 = scmp.ge.s32.totalorder %s19_s26, 4  }
 0x2f8   :  { %18 = sbr.rel (!%p16_p4) target bundleno = 3 (0x3), region = 78 }

</bundles_post_ra>
